<compile_context>
chip_gen: v5e
topology: v5e:2x2
jax: 0.10.0
libtpu: 0.0.40
codegen_flags: <defaults>
</compile_context>

<pallas_src>
import math

import jax
import jax.numpy as jnp
from jax import lax
from jax.experimental import pallas as pl
from jax.experimental.pallas import tpu as pltpu

TEMPERATURE = 0.07
BASE_TEMPERATURE = 0.07


def _round_up(x: int, m: int) -> int:
    return ((x + m - 1) // m) * m


def _positive_counts(labels):
    """Number of positives per row (same label, excluding self). O(B log B), no BxB."""
    B = labels.shape[0]
    order = jnp.argsort(labels)
    sl = labels[order]
    new_grp = jnp.concatenate(
        [jnp.ones((1,), jnp.int32), (sl[1:] != sl[:-1]).astype(jnp.int32)])
    grp = jnp.cumsum(new_grp) - 1
    counts_per_grp = jax.ops.segment_sum(jnp.ones((B,), jnp.float32), grp,
                                         num_segments=B)
    counts_sorted = counts_per_grp[grp]
    counts = jnp.zeros((B,), jnp.float32).at[order].set(counts_sorted)
    return counts - 1.0  # exclude self


def _make_kernel(temperature, base_temperature, b_actual, b_pad, tq, tk, shift):
    loss_scale = -(temperature / base_temperature)
    need_col_mask = b_actual != b_pad

    def kernel(fq_ref, fkT_ref, labq_ref, labk_ref, invp_ref, out_ref,
               denom_acc, psum_acc):
        qi = pl.program_id(0)
        ki = pl.program_id(1)

        @pl.when(ki == 0)
        def _init():
            denom_acc[...] = jnp.zeros_like(denom_acc)
            psum_acc[...] = jnp.zeros_like(psum_acc)

        # (tq, D) @ (D, tk) on the MXU; 1/T is already folded into both operands,
        # so `logits` == sim / T with zero per-tile VALU scaling work.
        logits = jnp.dot(fq_ref[...], fkT_ref[...],
                         preferred_element_type=jnp.float32)
        if shift:  # static: only for tiny temperatures (exp overflow guard)
            logits = logits - shift

        e_all = jnp.exp(logits)                       # (tq, tk)
        pos_lab = labq_ref[...] == labk_ref[...]      # (tq,1)==(1,tk) -> (tq,tk) bool

        row0 = qi * tq
        col0 = ki * tk
        # Does this tile straddle the self-similarity diagonal?
        needs_mask = jnp.logical_and(row0 < col0 + tk, col0 < row0 + tq)
        if need_col_mask:
            # ... or contain padded key columns (only possible near the end).
            needs_mask = jnp.logical_or(needs_mask, col0 + tk > b_actual)

        @pl.when(needs_mask)
        def _masked():
            row_g = row0 + lax.broadcasted_iota(jnp.int32, (tq, tk), 0)
            col_g = col0 + lax.broadcasted_iota(jnp.int32, (tq, tk), 1)
            keep = row_g != col_g                     # drop self-similarity
            if need_col_mask:
                keep = jnp.logical_and(keep, col_g < b_actual)
            denom_acc[...] += jnp.sum(jnp.where(keep, e_all, 0.0),
                                      axis=1, keepdims=True)
            psum_acc[...] += jnp.sum(
                jnp.where(jnp.logical_and(pos_lab, keep), logits, 0.0),
                axis=1, keepdims=True)

        @pl.when(jnp.logical_not(needs_mask))
        def _plain():
            # Off-diagonal, no padding: no iota, no masks, just the two reductions.
            denom_acc[...] += jnp.sum(e_all, axis=1, keepdims=True)
            psum_acc[...] += jnp.sum(jnp.where(pos_lab, logits, 0.0),
                                     axis=1, keepdims=True)

        @pl.when(ki == pl.num_programs(1) - 1)
        def _finalize():
            mean_log_prob_pos = (psum_acc[...] * invp_ref[...]
                                 - jnp.log(denom_acc[...]))
            out_ref[...] = (loss_scale * mean_log_prob_pos).astype(out_ref.dtype)

    return kernel


def contrastive_learning_loss(features, labels, *,
                              temperature=TEMPERATURE,
                              base_temperature=BASE_TEMPERATURE,
                              block_q=None, block_k=None,
                              matmul_dtype=jnp.bfloat16):
    """features: [B, D], labels: [B] int -> scalar f32 loss (mask=None path)."""
    B, D = features.shape
    labels = labels.reshape(B).astype(jnp.int32)

    # --- tile selection ---------------------------------------------------------
    if block_q is None or block_k is None:
        if B <= 512:
            b_pad_small = _round_up(B, 16)
            if b_pad_small >= 256:
                # >= 2 query blocks so the "parallel" axis splits across v7x's 2 TCs.
                tq, tk = b_pad_small // 2, b_pad_small
            else:
                tq = tk = b_pad_small
        else:
            # Larger tq halves the key re-stream HBM traffic (keys read B/tq times);
            # tiles stay well under v7x's 32 MiB scoped VMEM even for D in the KBs.
            tq = 256 if B < 2048 else 512
            tk = 256 if B < 1024 else 512
    else:
        tq, tk = int(block_q), int(block_k)

    b_pad = _round_up(B, math.lcm(tq, tk))
    if tq % 8 != 0 and tq != b_pad:
        raise ValueError("block_q must be a multiple of 8 (or the full padded batch)")
    if tk % 128 != 0 and tk != b_pad:
        raise ValueError("block_k must be a multiple of 128 (or the full padded batch)")

    # --- one-time normalization, 1/sqrt(T) scale fold, cast, transpose (XLA) -----
    f32 = features.astype(jnp.float32)
    inv_norm = lax.rsqrt(jnp.maximum(jnp.sum(f32 * f32, axis=1, keepdims=True),
                                     1e-24))
    fn = (f32 * (inv_norm * jnp.float32(math.sqrt(1.0 / temperature))))
    fn = fn.astype(matmul_dtype)

    # Precomputed 1/(num positives); inf for singleton labels -> NaN (matches torch 0/0).
    inv_pcnt = 1.0 / _positive_counts(labels)

    if b_pad != B:
        fn = jnp.pad(fn, ((0, b_pad - B), (0, 0)))
        labels = jnp.pad(labels, (0, b_pad - B), constant_values=-1)
        inv_pcnt = jnp.pad(inv_pcnt, (0, b_pad - B))

    fq = fn                     # (b_pad, D) query blocks
    fk_t = fn.T                 # (D, b_pad) keys, pre-transposed: no in-kernel vxpose
    lab_col = labels.reshape(b_pad, 1)
    lab_row = labels.reshape(1, b_pad)
    inv_pcnt = inv_pcnt.reshape(b_pad, 1)

    nq, nk = b_pad // tq, b_pad // tk

    # Constant shift only when exp(sim/T) could overflow f32 (tiny temperatures).
    shift = (1.0 / temperature) if (1.0 / temperature) > 60.0 else 0.0

    kernel = _make_kernel(temperature, base_temperature, B, b_pad, tq, tk, shift)

    per_sample = pl.pallas_call(
        kernel,
        out_shape=jax.ShapeDtypeStruct((b_pad, 1), jnp.float32),
        grid_spec=pltpu.PrefetchScalarGridSpec(
            num_scalar_prefetch=0,
            grid=(nq, nk),                                   # reduction axis last
            in_specs=[
                pl.BlockSpec((tq, D), lambda qi, ki: (qi, 0)),   # query features
                pl.BlockSpec((D, tk), lambda qi, ki: (0, ki)),   # keys (transposed)
                pl.BlockSpec((tq, 1), lambda qi, ki: (qi, 0)),   # query labels
                pl.BlockSpec((1, tk), lambda qi, ki: (0, ki)),   # key labels
                pl.BlockSpec((tq, 1), lambda qi, ki: (qi, 0)),   # 1/pos-count
            ],
            out_specs=pl.BlockSpec((tq, 1), lambda qi, ki: (qi, 0)),
            scratch_shapes=[pltpu.VMEM((tq, 1), jnp.float32)] * 2,
        ),
        compiler_params=pltpu.CompilerParams(
            dimension_semantics=("parallel", "arbitrary")),
    )(fq, fk_t, lab_col, lab_row, inv_pcnt)

    # Tiny final reduction (padded rows sliced off) in plain XLA.
    return jnp.mean(per_sample[:B, 0])


def _reference_loss(features, labels, temperature=TEMPERATURE,
                    base_temperature=BASE_TEMPERATURE):
    """Plain-JAX f32 reference reproducing the PyTorch forward (mask=None path)."""
    f = features.astype(jnp.float32)
    fn = f / jnp.maximum(jnp.sqrt(jnp.sum(f * f, axis=1, keepdims=True)), 1e-12)
    sim = jnp.dot(fn, fn.T, precision=lax.Precision.HIGHEST) / temperature
    logits = sim - jnp.max(sim, axis=1, keepdims=True)
    B = f.shape[0]
    pos = (labels[:, None] == labels[None, :]).astype(jnp.float32)
    lmask = 1.0 - jnp.eye(B, dtype=jnp.float32)
    mask = pos * lmask
    e = jnp.exp(logits) * lmask
    log_prob = logits - jnp.log(e.sum(1, keepdims=True))
    mean_log_prob_pos = (mask * log_prob).sum(1) / mask.sum(1)
    return jnp.mean(-(temperature / base_temperature) * mean_log_prob_pos)


if __name__ == "__main__":
    key = jax.random.PRNGKey(0)
    k1, k2, k3 = jax.random.split(key, 3)

    # Run 1: multi-block 2x2 grid (128x128 tiles), f32 MXU operands.
    B1, D1 = 256, 64
    feats1 = jax.random.normal(k1, (B1, D1), dtype=jnp.float32)
    labels1 = jnp.repeat(jnp.arange(B1 // 2, dtype=jnp.int32), 2)   # paired speakers
    loss1 = jax.block_until_ready(contrastive_learning_loss(
        feats1, labels1, block_q=128, block_k=128, matmul_dtype=jnp.float32))
    ref1 = jax.block_until_ready(_reference_loss(feats1, labels1))
    assert jnp.allclose(loss1, ref1, rtol=2e-2, atol=2e-2), (loss1, ref1)

    # Run 2: padded batch (200 -> 256), 4x2 grid, exercises diagonal / padding /
    # no-mask tile branches, bf16 MXU operands.
    B2, D2 = 200, 64
    feats2 = jax.random.normal(k2, (B2, D2), dtype=jnp.float32)
    labels2 = jnp.repeat(jnp.arange(B2 // 2, dtype=jnp.int32), 2)
    loss2 = jax.block_until_ready(contrastive_learning_loss(
        feats2, labels2, block_q=64, block_k=128, matmul_dtype=jnp.bfloat16))
    ref2 = jax.block_until_ready(_reference_loss(feats2, labels2))
    assert jnp.allclose(loss2, ref2, rtol=5e-2, atol=5e-2), (loss2, ref2)

    # Run 3: small auto-tiled path with batch padding (B=21 -> 32), f32 MXU.
    B3, D3 = 21, 32
    feats3 = jax.random.normal(k3, (B3, D3), dtype=jnp.float32)
    labels3 = jnp.arange(B3, dtype=jnp.int32) // 3                  # 7 speakers x 3
    loss3 = jax.block_until_ready(contrastive_learning_loss(
        feats3, labels3, matmul_dtype=jnp.float32))
    ref3 = jax.block_until_ready(_reference_loss(feats3, labels3))
    assert jnp.allclose(loss3, ref3, rtol=2e-2, atol=2e-2), (loss3, ref3)

    print("KERNEL_OK")
</pallas_src>

<mosaic_0001>
module attributes {stable_mosaic.version = 11 : i64} {
  func.func @kernel(%arg0: i32, %arg1: i32, %arg2: memref<128x64xf32, #tpu.memory_space<vmem>>, %arg3: memref<64x128xf32, #tpu.memory_space<vmem>>, %arg4: memref<128x1xi32, #tpu.memory_space<vmem>>, %arg5: memref<1x128xi32, #tpu.memory_space<vmem>>, %arg6: memref<128x1xf32, #tpu.memory_space<vmem>>, %arg7: memref<128x1xf32, #tpu.memory_space<vmem>>, %arg8: memref<128x1xf32, #tpu.memory_space<vmem>>, %arg9: memref<128x1xf32, #tpu.memory_space<vmem>>) attributes {dimension_semantics = [#tpu.dimension_semantics<parallel>, #tpu.dimension_semantics<arbitrary>], iteration_bounds = array<i64: 2, 2>, scalar_prefetch = 0 : i64, scratch_operands = 2 : i64, tpu.core_type = #tpu.core_type<tc>, window_params = [{transform_indices = @transform_0, window_bounds = array<i64: 128, 64>}, {transform_indices = @transform_1, window_bounds = array<i64: 64, 128>}, {transform_indices = @transform_2, window_bounds = array<i64: 128, 1>}, {transform_indices = @transform_3, window_bounds = array<i64: 1, 128>}, {transform_indices = @transform_4, window_bounds = array<i64: 128, 1>}, {transform_indices = @transform_5, window_bounds = array<i64: 128, 1>}]} {
    %c0_i32 = arith.constant 0 : i32
    %0 = arith.cmpi eq, %arg1, %c0_i32 : i32
    %1 = arith.extui %0 : i1 to i32
    %c0_i32_0 = arith.constant 0 : i32
    %2 = arith.cmpi ne, %1, %c0_i32_0 : i32
    scf.if %2 {
      %cst_14 = arith.constant 0.000000e+00 : f32
      %27 = vector.broadcast %cst_14 : f32 to vector<128x1xf32>
      %c0_15 = arith.constant 0 : index
      %c0_16 = arith.constant 0 : index
      %28 = vector.load %arg8[%c0_15, %c0_16] : memref<128x1xf32, #tpu.memory_space<vmem>>, vector<128x1xf32>
      tpu.vector_store %arg8[%c0_15, %c0_16], %27 {strides = array<i32>} : memref<128x1xf32, #tpu.memory_space<vmem>>, vector<128x1xf32>,
      %cst_17 = arith.constant 0.000000e+00 : f32
      %29 = vector.broadcast %cst_17 : f32 to vector<128x1xf32>
      %c0_18 = arith.constant 0 : index
      %c0_19 = arith.constant 0 : index
      %30 = vector.load %arg9[%c0_18, %c0_19] : memref<128x1xf32, #tpu.memory_space<vmem>>, vector<128x1xf32>
      tpu.vector_store %arg9[%c0_18, %c0_19], %29 {strides = array<i32>} : memref<128x1xf32, #tpu.memory_space<vmem>>, vector<128x1xf32>,
    } else {
    }
    %c0 = arith.constant 0 : index
    %c0_1 = arith.constant 0 : index
    %3 = vector.load %arg2[%c0, %c0_1] : memref<128x64xf32, #tpu.memory_space<vmem>>, vector<128x64xf32>
    %c0_2 = arith.constant 0 : index
    %c0_3 = arith.constant 0 : index
    %4 = vector.load %arg3[%c0_2, %c0_3] : memref<64x128xf32, #tpu.memory_space<vmem>>, vector<64x128xf32>
    %cst = arith.constant dense<0.000000e+00> : vector<128x128xf32>
    %5 = tpu.matmul %3, %4, %cst {dimension_numbers = #tpu.dot_dimension_numbers<[1], [0], [0], [1], [0, 0, 1, 1], [], []>} : vector<128x64xf32>, vector<64x128xf32>, vector<128x128xf32> -> vector<128x128xf32>
    %6 = math.exp %5 : vector<128x128xf32>
    %c0_4 = arith.constant 0 : index
    %c0_5 = arith.constant 0 : index
    %7 = vector.load %arg4[%c0_4, %c0_5] : memref<128x1xi32, #tpu.memory_space<vmem>>, vector<128x1xi32>
    %c0_6 = arith.constant 0 : index
    %c0_7 = arith.constant 0 : index
    %8 = vector.load %arg5[%c0_6, %c0_7] : memref<1x128xi32, #tpu.memory_space<vmem>>, vector<1x128xi32>
    %9 = vector.broadcast %7 : vector<128x1xi32> to vector<128x128xi32>
    %10 = vector.broadcast %8 : vector<1x128xi32> to vector<128x128xi32>
    %11 = arith.cmpi eq, %9, %10 : vector<128x128xi32>
    %c128_i32 = arith.constant 128 : i32
    %12 = arith.muli %arg0, %c128_i32 : i32
    %c128_i32_8 = arith.constant 128 : i32
    %13 = arith.muli %arg1, %c128_i32_8 : i32
    %c128_i32_9 = arith.constant 128 : i32
    %14 = arith.addi %13, %c128_i32_9 : i32
    %15 = arith.cmpi slt, %12, %14 : i32
    %c128_i32_10 = arith.constant 128 : i32
    %16 = arith.addi %12, %c128_i32_10 : i32
    %17 = arith.cmpi slt, %13, %16 : i32
    %18 = arith.andi %15, %17 : i1
    %19 = arith.extui %18 : i1 to i32
    %c0_i32_11 = arith.constant 0 : i32
    %20 = arith.cmpi ne, %19, %c0_i32_11 : i32
    scf.if %20 {
      %27 = tpu.iota {dimensions = array<i32: 0>} : vector<128x128xi32>
      %28 = vector.broadcast %12 : i32 to vector<128x128xi32>
      %29 = arith.addi %28, %27 : vector<128x128xi32>
      %30 = tpu.iota {dimensions = array<i32: 1>} : vector<128x128xi32>
      %31 = vector.broadcast %13 : i32 to vector<128x128xi32>
      %32 = arith.addi %31, %30 : vector<128x128xi32>
      %33 = arith.cmpi ne, %29, %32 : vector<128x128xi32>
      %c0_14 = arith.constant 0 : index
      %c0_15 = arith.constant 0 : index
      %34 = vector.load %arg8[%c0_14, %c0_15] : memref<128x1xf32, #tpu.memory_space<vmem>>, vector<128x1xf32>
      %cst_16 = arith.constant 0.000000e+00 : f32
      %35 = vector.broadcast %cst_16 : f32 to vector<128x128xf32>
      %36 = arith.select %33, %6, %35 : vector<128x128xi1>, vector<128x128xf32>
      %cst_17 = arith.constant dense<0.000000e+00> : vector<128xf32>
      %37 = vector.multi_reduction <add>, %36, %cst_17 [1] : vector<128x128xf32> to vector<128xf32>
      %38 = vector.shape_cast %37 : vector<128xf32> to vector<128x1xf32>
      %39 = arith.addf %34, %38 : vector<128x1xf32>
      %c0_18 = arith.constant 0 : index
      %c0_19 = arith.constant 0 : index
      %40 = vector.load %arg8[%c0_18, %c0_19] : memref<128x1xf32, #tpu.memory_space<vmem>>, vector<128x1xf32>
      tpu.vector_store %arg8[%c0_18, %c0_19], %39 {strides = array<i32>} : memref<128x1xf32, #tpu.memory_space<vmem>>, vector<128x1xf32>,
      %c0_20 = arith.constant 0 : index
      %c0_21 = arith.constant 0 : index
      %41 = vector.load %arg9[%c0_20, %c0_21] : memref<128x1xf32, #tpu.memory_space<vmem>>, vector<128x1xf32>
      %42 = arith.andi %11, %33 : vector<128x128xi1>
      %cst_22 = arith.constant 0.000000e+00 : f32
      %43 = vector.broadcast %cst_22 : f32 to vector<128x128xf32>
      %44 = arith.select %42, %5, %43 : vector<128x128xi1>, vector<128x128xf32>
      %cst_23 = arith.constant dense<0.000000e+00> : vector<128xf32>
      %45 = vector.multi_reduction <add>, %44, %cst_23 [1] : vector<128x128xf32> to vector<128xf32>
      %46 = vector.shape_cast %45 : vector<128xf32> to vector<128x1xf32>
      %47 = arith.addf %41, %46 : vector<128x1xf32>
      %c0_24 = arith.constant 0 : index
      %c0_25 = arith.constant 0 : index
      %48 = vector.load %arg9[%c0_24, %c0_25] : memref<128x1xf32, #tpu.memory_space<vmem>>, vector<128x1xf32>
      tpu.vector_store %arg9[%c0_24, %c0_25], %47 {strides = array<i32>} : memref<128x1xf32, #tpu.memory_space<vmem>>, vector<128x1xf32>,
    } else {
    }
    %true = arith.constant true
    %21 = arith.xori %18, %true : i1
    %22 = arith.extui %21 : i1 to i32
    %c0_i32_12 = arith.constant 0 : i32
    %23 = arith.cmpi ne, %22, %c0_i32_12 : i32
    scf.if %23 {
      %c0_14 = arith.constant 0 : index
      %c0_15 = arith.constant 0 : index
      %27 = vector.load %arg8[%c0_14, %c0_15] : memref<128x1xf32, #tpu.memory_space<vmem>>, vector<128x1xf32>
      %cst_16 = arith.constant dense<0.000000e+00> : vector<128xf32>
      %28 = vector.multi_reduction <add>, %6, %cst_16 [1] : vector<128x128xf32> to vector<128xf32>
      %29 = vector.shape_cast %28 : vector<128xf32> to vector<128x1xf32>
      %30 = arith.addf %27, %29 : vector<128x1xf32>
      %c0_17 = arith.constant 0 : index
      %c0_18 = arith.constant 0 : index
      %31 = vector.load %arg8[%c0_17, %c0_18] : memref<128x1xf32, #tpu.memory_space<vmem>>, vector<128x1xf32>
      tpu.vector_store %arg8[%c0_17, %c0_18], %30 {strides = array<i32>} : memref<128x1xf32, #tpu.memory_space<vmem>>, vector<128x1xf32>,
      %c0_19 = arith.constant 0 : index
      %c0_20 = arith.constant 0 : index
      %32 = vector.load %arg9[%c0_19, %c0_20] : memref<128x1xf32, #tpu.memory_space<vmem>>, vector<128x1xf32>
      %cst_21 = arith.constant 0.000000e+00 : f32
      %33 = vector.broadcast %cst_21 : f32 to vector<128x128xf32>
      %34 = arith.select %11, %5, %33 : vector<128x128xi1>, vector<128x128xf32>
      %cst_22 = arith.constant dense<0.000000e+00> : vector<128xf32>
      %35 = vector.multi_reduction <add>, %34, %cst_22 [1] : vector<128x128xf32> to vector<128xf32>
      %36 = vector.shape_cast %35 : vector<128xf32> to vector<128x1xf32>
      %37 = arith.addf %32, %36 : vector<128x1xf32>
      %c0_23 = arith.constant 0 : index
      %c0_24 = arith.constant 0 : index
      %38 = vector.load %arg9[%c0_23, %c0_24] : memref<128x1xf32, #tpu.memory_space<vmem>>, vector<128x1xf32>
      tpu.vector_store %arg9[%c0_23, %c0_24], %37 {strides = array<i32>} : memref<128x1xf32, #tpu.memory_space<vmem>>, vector<128x1xf32>,
    } else {
    }
    %c1_i32 = arith.constant 1 : i32
    %24 = arith.cmpi eq, %arg1, %c1_i32 : i32
    %25 = arith.extui %24 : i1 to i32
    %c0_i32_13 = arith.constant 0 : i32
    %26 = arith.cmpi ne, %25, %c0_i32_13 : i32
    scf.if %26 {
      %c0_14 = arith.constant 0 : index
      %c0_15 = arith.constant 0 : index
      %27 = vector.load %arg9[%c0_14, %c0_15] : memref<128x1xf32, #tpu.memory_space<vmem>>, vector<128x1xf32>
      %c0_16 = arith.constant 0 : index
      %c0_17 = arith.constant 0 : index
      %28 = vector.load %arg6[%c0_16, %c0_17] : memref<128x1xf32, #tpu.memory_space<vmem>>, vector<128x1xf32>
      %29 = arith.mulf %27, %28 : vector<128x1xf32>
      %c0_18 = arith.constant 0 : index
      %c0_19 = arith.constant 0 : index
      %30 = vector.load %arg8[%c0_18, %c0_19] : memref<128x1xf32, #tpu.memory_space<vmem>>, vector<128x1xf32>
      %31 = math.log %30 : vector<128x1xf32>
      %32 = arith.subf %29, %31 : vector<128x1xf32>
      %cst_20 = arith.constant -1.000000e+00 : f32
      %33 = vector.broadcast %cst_20 : f32 to vector<128x1xf32>
      %34 = arith.mulf %33, %32 : vector<128x1xf32>
      %c0_21 = arith.constant 0 : index
      %c0_22 = arith.constant 0 : index
      %35 = vector.load %arg7[%c0_21, %c0_22] : memref<128x1xf32, #tpu.memory_space<vmem>>, vector<128x1xf32>
      tpu.vector_store %arg7[%c0_21, %c0_22], %34 {strides = array<i32>} : memref<128x1xf32, #tpu.memory_space<vmem>>, vector<128x1xf32>,
    } else {
    }
    return
  }
  func.func @transform_0(%arg0: i32, %arg1: i32) -> (i32, i32) {
    %c0_i32 = arith.constant 0 : i32
    %c0_i32_0 = arith.constant 0 : i32
    return %arg0, %c0_i32 : i32, i32
  }
  func.func @transform_1(%arg0: i32, %arg1: i32) -> (i32, i32) {
    %c0_i32 = arith.constant 0 : i32
    %c0_i32_0 = arith.constant 0 : i32
    return %c0_i32, %arg1 : i32, i32
  }
  func.func @transform_2(%arg0: i32, %arg1: i32) -> (i32, i32) {
    %c0_i32 = arith.constant 0 : i32
    %c0_i32_0 = arith.constant 0 : i32
    return %arg0, %c0_i32 : i32, i32
  }
  func.func @transform_3(%arg0: i32, %arg1: i32) -> (i32, i32) {
    %c0_i32 = arith.constant 0 : i32
    %c0_i32_0 = arith.constant 0 : i32
    return %c0_i32, %arg1 : i32, i32
  }
  func.func @transform_4(%arg0: i32, %arg1: i32) -> (i32, i32) {
    %c0_i32 = arith.constant 0 : i32
    %c0_i32_0 = arith.constant 0 : i32
    return %arg0, %c0_i32 : i32, i32
  }
  func.func @transform_5(%arg0: i32, %arg1: i32) -> (i32, i32) {
    %c0_i32 = arith.constant 0 : i32
    %c0_i32_0 = arith.constant 0 : i32
    return %arg0, %c0_i32 : i32, i32
  }
}

</mosaic_0001>

<bundles_post_ra>
// kernel: tpu_custom_call.1
= control target key start
LH: loop header
LB: loop body
LE: loop exit
PB: predicated region body
PF: predicated region fallthrough
CT: control target
= control target key end

     0   :  { %s2494_s0 = inlined_call_operand.vmem [shape: f32[256,64], index: 0, kind: input, shape index: {}]   ;;  %s2495_s1 = inlined_call_operand.vmem [shape: f32[64,256], index: 1, kind: input, shape index: {}]   ;;  %s2496_s2 = inlined_call_operand.vmem [shape: s32[256,1], index: 2, kind: input, shape index: {}]   ;;  %s2497_s3 = inlined_call_operand.vmem [shape: s32[1,256], index: 3, kind: input, shape index: {}]   ;;  %s2498_s4 = inlined_call_operand.vmem [shape: f32[256,1], index: 4, kind: input, shape index: {}]   ;;  %s2499_s5 = inlined_call_operand.vmem [shape: f32[256,1], index: 5, kind: output, shape index: {}]  }
   0x1   :  { %2519 = sst [smem:[#allocation15_spill]] %s2495_s1 }
   0x2   :  { %s1667_s18 = smov 0   ;;  %s1669_s19 = smov 0  }
   0x3   :  { %s1671_s20 = smov 0   ;;  %s1673_s21 = smov 0  }
   0x4   :  { %s1675_s22 = smov 0   ;;  %s1677_s23 = smov 0  }
   0x5   :  { %s1679_s24 = smov 0  }
   0x6 LB: > { %s24_s25 = sadd.s32 1, %s1625_s22  ;;  %s27_s26 = sadd.s32 1, %s1629_s23  ;;  %s1633_s24 = sphi %s1679_s24, %s15_s24   ;;  %s1629_s23 = sphi %s1677_s23, %s2577_s23   ;;  %s1625_s22 = sphi %s1675_s22, %s2576_s22   ;;  %s1621_s21 = sphi %s1673_s21, %s2575_s21   ;;  %s1617_s20 = sphi %s1671_s20, %s2574_s20   ;;  %s1613_s19 = sphi %s1669_s19, %s2573_s19   ;;  %s1609_s18 = sphi %s1667_s18, %s2572_s18  }
   0x7   : > { %p25_p0 = scmp.ge.s32.totalorder %s24_s25, 2  ;;  %s60_s27 = sadd.s32 1, %s1613_s19 }
   0x8   : > { %p67_p1 = scmp.ne.s32.totalorder %s1613_s19, %s1609_s18  ;;  %p68_p2 = scmp.eq.s32.totalorder %s1633_s24, 0 }
   0x9   : > { %s2579_s25 = smov (%p25_p0, %s24_s25), 0  ;;  %s2581_s26 = smov (!%p25_p0, %s27_s26), %s1629_s23 }
   0xa   : > { %s57_s28 = ssub.s32 %s1625_s22, %s2579_s25  ;;  %p69_p3 = por %p68_p2, %p67_p1 }
   0xb   : > { %p29_p4 = scmp.ge.s32.totalorder %s2581_s26, 2  ;;  %p58_p5 = scmp.eq.s32.totalorder %s57_s28, 0 }
   0xc   : > { %p1394_p6 = scmp.ge.s32.totalorder %s1633_s24, 4 }
   0xd   : > { %s2583_s26 = smov (%p29_p4, %s2581_s26), 0 }
   0xe   : > { %s1716_s29 = scalar_select %p58_p5, %s1613_s19, %s60_s27  }
   0xf   : > { %197 = sbr.rel (%p1394_p6) target bundleno = 38 (0x26), region = 16 }
  0x14   : > { %209 = sbr.rel (!%p69_p3) target bundleno = 38 (0x26), region = 24  ;;  %s211_s30 = sand.u32 (%p69_p3), 1, %s1613_s19  }
  0x15   : > { %s1396_s6 = sshll.u32 (%p69_p3), %s1625_s22, 3  ;;  %s1395_s7 = sshll.u32 (%p69_p3), %s211_s30, 6 }
  0x16   : > { %s2520_s1 = sld [smem:[#allocation15_spill]] (%p69_p3)  ;;  %s213_s11 = scalar_lea.vmem (%p69_p3), [#allocation4], %s1395_s7 }
  0x1c   : > { %s215_s10 = scalar_lea.vmem %s2520_s1, %s1396_s6 }
  0x1d   : > { %v258_v0 = vld [vmem:[%s215_s10] sm:$0xff]  ;;  %v260_v1 = vld [vmem:[%s215_s10 + $0x10] sm:$0xff] }
  0x1e   : > { %v262_v2 = vld [vmem:[%s215_s10 + $0x20] sm:$0xff]  ;;  %259 = vst [vmem:[%s213_s11] sm:$0xff] %v258_v0  ;;  %v264_v3 = vld [vmem:[%s215_s10 + $0x30] sm:$0xff] }
  0x1f   : > { %261 = vst [vmem:[%s213_s11 + $0x8] sm:$0xff] %v260_v1  ;;  %v266_v4 = vld [vmem:[%s215_s10 + $0x40] sm:$0xff]  ;;  %v268_v5 = vld [vmem:[%s215_s10 + $0x50] sm:$0xff] }
  0x20   : > { %263 = vst [vmem:[%s213_s11 + $0x10] sm:$0xff] %v262_v2  ;;  %v270_v6 = vld [vmem:[%s215_s10 + $0x60] sm:$0xff]  ;;  %v272_v7 = vld [vmem:[%s215_s10 + $0x70] sm:$0xff] }
  0x21   : > { %265 = vst [vmem:[%s213_s11 + $0x18] sm:$0xff] %v264_v3 }
  0x22   : > { %267 = vst [vmem:[%s213_s11 + $0x20] sm:$0xff] %v266_v4 }
  0x23   : > { %269 = vst [vmem:[%s213_s11 + $0x28] sm:$0xff] %v268_v5 }
  0x24   : > { %271 = vst [vmem:[%s213_s11 + $0x30] sm:$0xff] %v270_v6 }
  0x25   : > { %273 = vst [vmem:[%s213_s11 + $0x38] sm:$0xff] %v272_v7 }
  0x26 PF: > { %p1397_p7 = scmp.ge.s32.totalorder %s1633_s24, 1  ;;  %p302_p8 = scmp.lt.s32.totalorder %s1633_s24, 5 }
  0x28   : > { %p303_p9 = pnand %p1397_p7, %p302_p8 }
  0x2a   : > { %306 = sbr.rel (%p303_p9) target bundleno = 726 (0x2d6), region = 74 }
  0x2f   : > { %s309_s12 = sand.u32 1, %s1609_s18   ;;  %s1399_s13 = sshll.u32 %s1621_s21, 4 }
  0x30   : > { %s1398_s14 = sshll.u32 %s309_s12, 6  ;;  %p355_p10 = scmp.lt.s32.totalorder %s1399_s13, 31 }
  0x31   : > { %p366_p11 = scmp.lt.s32.totalorder %s1617_s20, 1  ;;  %s1756_s27 = scalar_lea.vmem [#allocation4], %s1398_s14 }
  0x32   : > { %s2585_s13 = smov (!%p355_p10, %s1399_s13), 31  ;;  %p1407_p12 = scmp.ne.s32.totalorder %s1617_s20, 0 }
  0x33   : > { %s1730_s15 = scalar_select %p366_p11, %s1617_s20, 1 }
  0x34   : > { %s1400_s16 = sshll.u32 %s2585_s13, 3  ;;  %384 = sbr.rel (%p1407_p12) target bundleno = 90 (0x5a), region = 82 }
  0x35   : > { %s1735_s28 = scalar_lea.vmem %s2494_s0, %s1400_s16  ;;  %s1740_s7 = scalar_lea.vmem %s2496_s2, %s1400_s16 }
  0x36   : > { %s368_s9 = scalar_lea.vmem %s2497_s3, %s1730_s15  ;;  %s1749_s12 = scalar_lea.vmem %s2498_s4, %s1400_s16 }
  0x37   : > { %s1754_s17 = scalar_lea.vmem %s2499_s5, %s1400_s16 }
  0x39   : > { %vm385_vm0 = vcmask 7168   ;;  %v1635_v8 = vmov 0.0  }
  0x3a   : > { %386 = vst.msk [vmem:[#allocation2] sm:$0xff] %vm385_vm0, %v1635_v8 }
  0x3b   : > { %387 = vst.msk [vmem:[#allocation2 + $0x8] sm:$0xff] %vm385_vm0, %v1635_v8 }
  0x3c   : > { %388 = vst.msk [vmem:[#allocation2 + $0x10] sm:$0xff] %vm385_vm0, %v1635_v8 }
  0x3d   : > { %389 = vst.msk [vmem:[#allocation2 + $0x18] sm:$0xff] %vm385_vm0, %v1635_v8 }
  0x3e   : > { %390 = vst.msk [vmem:[#allocation2 + $0x20] sm:$0xff] %vm385_vm0, %v1635_v8 }
  0x3f   : > { %391 = vst.msk [vmem:[#allocation2 + $0x28] sm:$0xff] %vm385_vm0, %v1635_v8 }
  0x40   : > { %392 = vst.msk [vmem:[#allocation2 + $0x30] sm:$0xff] %vm385_vm0, %v1635_v8 }
  0x41   : > { %393 = vst.msk [vmem:[#allocation2 + $0x38] sm:$0xff] %vm385_vm0, %v1635_v8 }
  0x42   : > { %394 = vst.msk [vmem:[#allocation2 + $0x40] sm:$0xff] %vm385_vm0, %v1635_v8 }
  0x43   : > { %395 = vst.msk [vmem:[#allocation2 + $0x48] sm:$0xff] %vm385_vm0, %v1635_v8 }
  0x44   : > { %396 = vst.msk [vmem:[#allocation2 + $0x50] sm:$0xff] %vm385_vm0, %v1635_v8 }
  0x45   : > { %397 = vst.msk [vmem:[#allocation2 + $0x58] sm:$0xff] %vm385_vm0, %v1635_v8 }
  0x46   : > { %398 = vst.msk [vmem:[#allocation2 + $0x60] sm:$0xff] %vm385_vm0, %v1635_v8 }
  0x47   : > { %399 = vst.msk [vmem:[#allocation2 + $0x68] sm:$0xff] %vm385_vm0, %v1635_v8 }
  0x48   : > { %400 = vst.msk [vmem:[#allocation2 + $0x70] sm:$0xff] %vm385_vm0, %v1635_v8 }
  0x49   : > { %401 = vst.msk [vmem:[#allocation2 + $0x78] sm:$0xff] %vm385_vm0, %v1635_v8 }
  0x4a   : > { %402 = vst.msk [vmem:[#allocation3] sm:$0xff] %vm385_vm0, %v1635_v8 }
  0x4b   : > { %403 = vst.msk [vmem:[#allocation3 + $0x8] sm:$0xff] %vm385_vm0, %v1635_v8 }
  0x4c   : > { %404 = vst.msk [vmem:[#allocation3 + $0x10] sm:$0xff] %vm385_vm0, %v1635_v8 }
  0x4d   : > { %405 = vst.msk [vmem:[#allocation3 + $0x18] sm:$0xff] %vm385_vm0, %v1635_v8 }
  0x4e   : > { %406 = vst.msk [vmem:[#allocation3 + $0x20] sm:$0xff] %vm385_vm0, %v1635_v8 }
  0x4f   : > { %407 = vst.msk [vmem:[#allocation3 + $0x28] sm:$0xff] %vm385_vm0, %v1635_v8 }
  0x50   : > { %408 = vst.msk [vmem:[#allocation3 + $0x30] sm:$0xff] %vm385_vm0, %v1635_v8 }
  0x51   : > { %409 = vst.msk [vmem:[#allocation3 + $0x38] sm:$0xff] %vm385_vm0, %v1635_v8 }
  0x52   : > { %410 = vst.msk [vmem:[#allocation3 + $0x40] sm:$0xff] %vm385_vm0, %v1635_v8 }
  0x53   : > { %411 = vst.msk [vmem:[#allocation3 + $0x48] sm:$0xff] %vm385_vm0, %v1635_v8 }
  0x54   : > { %412 = vst.msk [vmem:[#allocation3 + $0x50] sm:$0xff] %vm385_vm0, %v1635_v8 }
  0x55   : > { %413 = vst.msk [vmem:[#allocation3 + $0x58] sm:$0xff] %vm385_vm0, %v1635_v8 }
  0x56   : > { %414 = vst.msk [vmem:[#allocation3 + $0x60] sm:$0xff] %vm385_vm0, %v1635_v8 }
  0x57   : > { %415 = vst.msk [vmem:[#allocation3 + $0x68] sm:$0xff] %vm385_vm0, %v1635_v8 }
  0x58   : > { %416 = vst.msk [vmem:[#allocation3 + $0x70] sm:$0xff] %vm385_vm0, %v1635_v8 }
  0x59   : > { %417 = vst.msk [vmem:[#allocation3 + $0x78] sm:$0xff] %vm385_vm0, %v1635_v8 }
  0x5a PF: > { %v441_v9 = vld [vmem:[%s1756_s27 + $0x38] sm:$0xff]  ;;  %v590_v10 = vld [vmem:[%s1740_s7 + $0x10] sm:$0xff]  ;;  %v588_v11 = vld [vmem:[%s1740_s7] sm:$0xff]  ;;  %v1636_v12 = vmov 0   ;;  %vm442_vm1 = vcmask 523264   ;;  %s1845_s1 = sshll.u32 %s1621_s21, 7 }
  0x5b   : > { %1512 = vset.pattern.permute.xlu1 %v1636_v12  ;;  %1511 = vset.pattern.permute.xlu0 %v1636_v12  ;;  %v440_v13 = vld [vmem:[%s1756_s27 + $0x30] sm:$0xff]  ;;  %v439_v14 = vld [vmem:[%s1756_s27 + $0x28] sm:$0xff]  ;;  %v438_v15 = vld [vmem:[%s1756_s27 + $0x20] sm:$0xff]  ;;  %s1848_s14 = sshll.u32 %s1617_s20, 7  ;;  %s674_s30 = sadd.s32 128, %s1845_s1 }
  0x5c   : > { %1430 = vmatpush.msra.mxu2 %v441_v9  ;;  %1431 = vmatpush.msra.mxu3 %v441_v9  ;;  %v437_v16 = vld [vmem:[%s1756_s27 + $0x18] sm:$0xff]  ;;  %v589_v18 = vld [vmem:[%s1740_s7 + $0x8] sm:$0xff]  ;;  %v436_v19 = vld [vmem:[%s1756_s27 + $0x10] sm:$0xff]  ;;  %s672_s16 = sadd.s32 128, %s1848_s14  ;;  %p1860_p0 = scmp.lt.s32.totalorder %s1848_s14, %s674_s30 }
  0x5d   : > { %612 = vperm.xlu1 %1512, %v590_v10   ;;  %606 = vperm.xlu0 %1511, %v588_v11   ;;  %v591_v17 = vld [vmem:[%s1740_s7 + $0x18] sm:$0xff]  ;;  %v435_v20 = vld [vmem:[%s1756_s27 + $0x8] sm:$0xff]  ;;  %v434_v21 = vld [vmem:[%s1756_s27] sm:$0xff]  ;;  %p1855_p13 = scmp.lt.s32.totalorder %s1845_s1, %s672_s16 }
  0x5e   : > { %1433 = vmatpush.msra.mxu2 %v440_v13  ;;  %1434 = vmatpush.msra.mxu3 %v440_v13  ;;  %v426_v22 = vld [vmem:[%s1735_s28 + $0x40] sm:$0xff]  ;;  %v595_v24 = vld [vmem:[%s1740_s7 + $0x38] sm:$0xff]  ;;  %v594_v25 = vld [vmem:[%s1740_s7 + $0x30] sm:$0xff] }
  0x5f   : > { %499 = vmatpush.msra.mxu0 %v441_v9  ;;  %1429 = vmatpush.msra.mxu1 %v441_v9  ;;  %v430_v23 = vld [vmem:[%s1735_s28 + $0x60] sm:$0xff]  ;;  %v427_v29 = vld [vmem:[%s1735_s28 + $0x48] sm:$0xff]  ;;  %v598_v31 = vld [vmem:[%s1740_s7 + $0x50] sm:$0xff]  ;;  %p676_p1 = pnand %p1860_p0, %p1855_p13 }
  0x60   : > { %1436 = vmatpush.msra.mxu2 %v439_v14  ;;  %1437 = vmatpush.msra.mxu3 %v439_v14  ;;  %v592_v26 = vld [vmem:[%s1740_s7 + $0x20] sm:$0xff]  ;;  %v431_v30 = vld [vmem:[%s1735_s28 + $0x68] sm:$0xff]  ;;  %v428_v36 = vld [vmem:[%s1735_s28 + $0x50] sm:$0xff] }
  0x61   : > { %500 = vmatpush.msra.mxu0 %v440_v13  ;;  %1432 = vmatpush.msra.mxu1 %v440_v13  ;;  %v418_v27 = vld [vmem:[%s1735_s28] sm:$0xff]  ;;  %v597_v32 = vld [vmem:[%s1740_s7 + $0x48] sm:$0xff]  ;;  %v432_v37 = vld [vmem:[%s1735_s28 + $0x70] sm:$0xff] }
  0x62   : > { %1439 = vmatpush.msra.mxu2 %v438_v15  ;;  %1440 = vmatpush.msra.mxu3 %v438_v15  ;;  %v422_v28 = vld [vmem:[%s1735_s28 + $0x20] sm:$0xff]  ;;  %v593_v33 = vld [vmem:[%s1740_s7 + $0x28] sm:$0xff]  ;;  %v420_v41 = vld [vmem:[%s1735_s28 + $0x10] sm:$0xff] }
  0x63   : > { %501 = vmatpush.msra.mxu0 %v439_v14  ;;  %1435 = vmatpush.msra.mxu1 %v439_v14  ;;  %v419_v34 = vld [vmem:[%s1735_s28 + $0x8] sm:$0xff]  ;;  %v600_v39 = vld [vmem:[%s1740_s7 + $0x60] sm:$0xff]  ;;  %v424_v42 = vld [vmem:[%s1735_s28 + $0x30] sm:$0xff] }
  0x64   : > { %1442 = vmatpush.msra.mxu2 %v437_v16  ;;  %1443 = vmatpush.msra.mxu3 %v437_v16  ;;  %v423_v35 = vld [vmem:[%s1735_s28 + $0x28] sm:$0xff]  ;;  %v596_v40 = vld [vmem:[%s1740_s7 + $0x40] sm:$0xff]  ;;  %v429_v43 = vld [vmem:[%s1735_s28 + $0x58] sm:$0xff] }
  0x65   : > { %615 = vperm.xlu1 %1512, %v591_v17   ;;  %609 = vperm.xlu0 %1511, %v589_v18   ;;  %v601_v38 = vld [vmem:[%s1740_s7 + $0x68] sm:$0xff]  ;;  %v433_v44 = vld [vmem:[%s1735_s28 + $0x78] sm:$0xff]  ;;  %v602_v49 = vld [vmem:[%s1740_s7 + $0x70] sm:$0xff] }
  0x66   : > { %1445 = vmatpush.msra.mxu2 %v436_v19  ;;  %1446 = vmatpush.msra.mxu3 %v436_v19  ;;  %v603_v45 = vld [vmem:[%s1740_s7 + $0x78] sm:$0xff]  ;;  %v1874_v50 = vld [vmem:[%s368_s9] ss:$0 sm:$0xff] }
  0x67   : > { %502 = vmatpush.msra.mxu0 %v438_v15  ;;  %1438 = vmatpush.msra.mxu1 %v438_v15  ;;  %v599_v46 = vld [vmem:[%s1740_s7 + $0x58] sm:$0xff] }
  0x68   : > { %1448 = vmatpush.msra.mxu2 %v435_v20  ;;  %1449 = vmatpush.msra.mxu3 %v435_v20  ;;  %v421_v47 = vld [vmem:[%s1735_s28 + $0x18] sm:$0xff] }
  0x69   : > { %503 = vmatpush.msra.mxu0 %v437_v16  ;;  %1441 = vmatpush.msra.mxu1 %v437_v16  ;;  %v425_v48 = vld [vmem:[%s1735_s28 + $0x38] sm:$0xff] }
  0x6a   : > { %1451 = vmatpush.msra.mxu2 %v434_v21  ;;  %1452 = vmatpush.msra.mxu3 %v434_v21 }
  0x6b   : > { %1416 = vmatmul.msk.f32.vlgmr.msra.gmra.mxu2 %vm442_vm1, %v426_v22  ;;  %1420 = vmatmul.msk.f32.vlgmr.msra.gmra.mxu3 %vm442_vm1, %v430_v23 }
  0x6c   : > { %504 = vmatpush.msra.mxu0 %v436_v19  ;;  %1444 = vmatpush.msra.mxu1 %v436_v19 }
  0x6d   : > { %1513 = vset.pattern.permute.xlu2 %v1636_v12  ;;  %627 = vperm.xlu1 %1512, %v595_v24  }
  0x6e   : > { %624 = vperm.xlu0 %1511, %v594_v25   ;;  %618 = vperm.xlu2 %1513, %v592_v26  }
  0x6f   : > { %505 = vmatpush.msra.mxu0 %v435_v20  ;;  %1447 = vmatpush.msra.mxu1 %v435_v20 }
  0x71   : > { %506 = vmatpush.msra.mxu0 %v434_v21  ;;  %1450 = vmatpush.msra.mxu1 %v434_v21 }
  0x72   : > { %1408 = vmatmul.msk.f32.vlgmr.msra.gmra.mxu0 %vm442_vm1, %v418_v27  ;;  %1412 = vmatmul.msk.f32.vlgmr.msra.gmra.mxu1 %vm442_vm1, %v422_v28 }
  0x73   : > { %1417 = vmatmul.msk.f32.gmra.mxu2 %vm442_vm1, %v427_v29  ;;  %1421 = vmatmul.msk.f32.gmra.mxu3 %vm442_vm1, %v431_v30 }
  0x75   : > { %636 = vperm.xlu1 %1512, %v598_v31  }
  0x76   : > { %633 = vperm.xlu0 %1511, %v597_v32   ;;  %621 = vperm.xlu2 %1513, %v593_v33  }
  0x7a   : > { %1409 = vmatmul.msk.f32.gmra.mxu0 %vm442_vm1, %v419_v34  ;;  %1413 = vmatmul.msk.f32.gmra.mxu1 %vm442_vm1, %v423_v35 }
  0x7b   : > { %1418 = vmatmul.msk.f32.gmra.mxu2 %vm442_vm1, %v428_v36  ;;  %1422 = vmatmul.msk.f32.gmra.mxu3 %vm442_vm1, %v432_v37 }
  0x7d   : > { %645 = vperm.xlu1 %1512, %v601_v38  }
  0x7e   : > { %642 = vperm.xlu0 %1511, %v600_v39   ;;  %630 = vperm.xlu2 %1513, %v596_v40  }
  0x82   : > { %1410 = vmatmul.msk.f32.gmra.mxu0 %vm442_vm1, %v420_v41  ;;  %1414 = vmatmul.msk.f32.gmra.mxu1 %vm442_vm1, %v424_v42 }
  0x83   : > { %1419 = vmatmul.msk.f32.gmra.mxu2 %vm442_vm1, %v429_v43  ;;  %1423 = vmatmul.msk.f32.gmra.mxu3 %vm442_vm1, %v433_v44 }
  0x86   : > { %651 = vperm.xlu0 %1511, %v603_v45   ;;  %639 = vperm.xlu2 %1513, %v599_v46  }
  0x8a   : > { %1411 = vmatmul.msk.f32.gmra.mxu0 %vm442_vm1, %v421_v47  ;;  %1415 = vmatmul.msk.f32.gmra.mxu1 %vm442_vm1, %v425_v48 }
  0x8e   : > { %648 = vperm.xlu2 %1513, %v602_v49  }
  0xc8   : > { %v1876_v51 = vpop.permute.xlu2 %618 }
  0xc9   : > { %vm658_vm2 = vcmp.eq.s32.totalorder %v1876_v51, %v1874_v50 }
  0xcf   : > { %v1880_v52 = vpop.permute.xlu1 %612  ;;  %v1882_v53 = vpop.permute.xlu0 %606 }
  0xd0   : > { %vm656_vm3 = vcmp.eq.s32.totalorder %v1880_v52, %v1874_v50  ;;  %vm654_vm4 = vcmp.eq.s32.totalorder %v1882_v53, %v1874_v50  ;;  %v1888_v54 = vpop.permute.xlu2 %621 }
  0xd1   : > { %vm2518_vm5 = vcmp.eq.s32.totalorder %v1888_v54, %v1874_v50 }
  0xd7   : > { %v1892_v55 = vpop.permute.xlu1 %615  ;;  %v1894_v56 = vpop.permute.xlu0 %609 }
  0xd8   : > { %vm657_vm6 = vcmp.eq.s32.totalorder %v1892_v55, %v1874_v50  ;;  %vm655_vm7 = vcmp.eq.s32.totalorder %v1894_v56, %v1874_v50  ;;  %v1900_v57 = vpop.permute.xlu2 %630 }
  0xdf   : > { %v1904_v58 = vpop.permute.xlu1 %627 }
  0xe0   : > { %v1908_v59 = vpop.permute.xlu0 %624  ;;  %v1910_v60 = vpop.permute.xlu2 %639 }
  0xe7   : > { %v1916_v61 = vpop.permute.xlu1 %636 }
  0xe8   : > { %v1920_v62 = vpop.permute.xlu0 %633  ;;  %v1922_v63 = vpop.permute.xlu2 %648 }
  0xee   : > { %v1928_v0 = vpop.f32.mrf.mxu2  ;;  %v1930_v1 = vpop.f32.mrf.mxu3 }
  0xef   : > { %v1932_v2 = vpop.f32.mrf.mxu0  ;;  %v1934_v3 = vpop.f32.mrf.mxu1  ;;  %v572_v4 = vmul.f32 1.442695, %v1928_v0  ;;  %v580_v7 = vmul.f32 1.442695, %v1930_v1 }
  0xf0   : > { %v556_v5 = vmul.f32 1.442695, %v1932_v2  ;;  %v564_v6 = vmul.f32 1.442695, %v1934_v3  ;;  %v1940_v8 = vpop.permute.xlu1 %645  ;;  %v1942_v9 = vpop.permute.xlu0 %642 }
  0xf1   : > { %1515 = vpow2.f32 %v572_v4 }
  0xf2   : > { %1517 = vpow2.f32 %v556_v5 }
  0xf3   : > { %1519 = vpow2.f32 %v564_v6 }
  0xf4   : > { %1521 = vpow2.f32 %v580_v7 }
  0xf6   : > { %v1948_v10 = vpop.f32.mrf.mxu2  ;;  %v1950_v11 = vpop.f32.mrf.mxu3 }
  0xf7   : > { %v1952_v12 = vpop.eup %1515  ;;  %v1954_v13 = vpop.f32.mrf.mxu0  ;;  %v574_v15 = vmul.f32 1.442695, %v1948_v10  ;;  %v582_v19 = vmul.f32 1.442695, %v1950_v11 }
  0xf8   : > { %2523 = vst [vmem:[#allocation5_spill] sm:$0xff] %v1952_v12  ;;  %v1956_v14 = vpop.f32.mrf.mxu1  ;;  %v1959_v16 = vpop.eup %1517  ;;  %v558_v17 = vmul.f32 1.442695, %v1954_v13 }
  0xf9   : > { %2524 = vst [vmem:[#allocation6_spill] sm:$0xff] %v1959_v16  ;;  %v566_v18 = vmul.f32 1.442695, %v1956_v14  ;;  %v1964_v20 = vpop.permute.xlu0 %651  ;;  %v1966_v21 = vpop.eup %1519  ;;  %1523 = vpow2.f32 %v574_v15 }
  0xfa   : > { %2525 = vst [vmem:[#allocation7_spill] sm:$0xff] %v1966_v21  ;;  %v1970_v22 = vpop.eup %1521  ;;  %1525 = vpow2.f32 %v558_v17 }
  0xfb   : > { %1527 = vpow2.f32 %v566_v18 }
  0xfc   : > { %1529 = vpow2.f32 %v582_v19 }
  0xfe   : > { %v1972_v23 = vpop.f32.mrf.mxu2  ;;  %v1974_v24 = vpop.f32.mrf.mxu3 }
  0xff   : > { %v1976_v25 = vpop.eup %1523  ;;  %v1978_v26 = vpop.f32.mrf.mxu0  ;;  %v576_v28 = vmul.f32 1.442695, %v1972_v23  ;;  %v584_v32 = vmul.f32 1.442695, %v1974_v24 }
 0x100   : > { %2526 = vst [vmem:[#allocation8_spill] sm:$0xff] %v1976_v25  ;;  %v1980_v27 = vpop.f32.mrf.mxu1  ;;  %v1983_v29 = vpop.eup %1525  ;;  %v560_v30 = vmul.f32 1.442695, %v1978_v26 }
 0x101   : > { %2527 = vst [vmem:[#allocation9_spill] sm:$0xff] %v1983_v29  ;;  %v568_v31 = vmul.f32 1.442695, %v1980_v27  ;;  %v1988_v33 = vpop.eup %1527  ;;  %1531 = vpow2.f32 %v576_v28 }
 0x102   : > { %2528 = vst [vmem:[#allocation10_spill] sm:$0xff] %v1988_v33  ;;  %v1990_v34 = vpop.eup %1529  ;;  %1533 = vpow2.f32 %v560_v30 }
 0x103   : > { %1535 = vpow2.f32 %v568_v31 }
 0x104   : > { %1537 = vpow2.f32 %v584_v32 }
 0x106   : > { %v1992_v35 = vpop.f32.mrf.mxu2  ;;  %v1994_v36 = vpop.f32.mrf.mxu3 }
 0x107   : > { %v1996_v37 = vpop.eup %1531  ;;  %v1998_v38 = vpop.f32.mrf.mxu0  ;;  %v578_v40 = vmul.f32 1.442695, %v1992_v35  ;;  %v586_v44 = vmul.f32 1.442695, %v1994_v36 }
 0x108   : > { %v2000_v39 = vpop.f32.mrf.mxu1  ;;  %v2003_v41 = vpop.eup %1533  ;;  %v562_v42 = vmul.f32 1.442695, %v1998_v38 }
 0x109   : > { %2529 = vst [vmem:[#allocation11_spill] sm:$0xff] %v2003_v41  ;;  %v570_v43 = vmul.f32 1.442695, %v2000_v39  ;;  %v2008_v45 = vpop.eup %1535  ;;  %1539 = vpow2.f32 %v578_v40 }
 0x10a   : > { %2530 = vst [vmem:[#allocation12_spill] sm:$0xff] %v2008_v45  ;;  %v2010_v46 = vpop.eup %1537  ;;  %1541 = vpow2.f32 %v562_v42 }
 0x10b   : > { %1543 = vpow2.f32 %v570_v43 }
 0x10c   : > { %1545 = vpow2.f32 %v586_v44 }
 0x10e   : > { %679 = sbr.rel (%p676_p1) target bundleno = 484 (0x1e4), region = 86 }
 0x10f   : > { %v2012_v47 = vpop.eup %1539 }
 0x110   : > { %v2014_v48 = vpop.eup %1541 }
 0x111   : > { %2531 = vst [vmem:[#allocation13_spill] sm:$0xff] %v2014_v48  ;;  %v2016_v49 = vpop.eup %1543 }
 0x112   : > { %2532 = vst [vmem:[#allocation14_spill] sm:$0xff] %v2016_v49  ;;  %v2018_v4 = vpop.eup %1545 }
 0x113   : > { %v680_v5 = vlaneseq  ;;  %v2026_v6 = vstv %s1845_s1  ;;  %v716_v7 = vstv %s1848_s14 }
 0x115   : > { %v2029_v15 = vshrl.u32 %v680_v5, 7  ;;  %v715_v17 = vand.u32 127, %v680_v5 }
 0x117   : > { %v2033_v18 = vadd.s32 %v2026_v6, %v2029_v15  ;;  %v2035_v19 = vadd.s32 %v716_v7, %v715_v17  ;;  %v683_v28 = vadd.s32 16, %v2029_v15  ;;  %v685_v30 = vadd.s32 32, %v2029_v15 }
 0x118   : > { %v684_v31 = vadd.s32 24, %v2029_v15  ;;  %v682_v32 = vadd.s32 8, %v2029_v15  ;;  %v686_v40 = vadd.s32 40, %v2029_v15 }
 0x119   : > { %vm718_vm1 = vcmp.ne.s32.totalorder %v2033_v18, %v2035_v19  ;;  %v2045_v42 = vadd.s32 %v2026_v6, %v683_v28  ;;  %v2048_v43 = vadd.s32 %v2026_v6, %v685_v30 }
 0x11a   : > { %v750_v44 = vsel %vm718_vm1, %v1959_v16, 0.0  ;;  %v2055_v5 = vadd.s32 %v2026_v6, %v682_v32  ;;  %v2062_v7 = vadd.s32 %v2026_v6, %v684_v31  ;;  %v2065_v17 = vadd.s32 %v2026_v6, %v686_v40 }
 0x11b   : > { %766 = vadd.xlane.f32.xlu0 %v750_v44  ;;  %vm720_vm14 = vcmp.ne.s32.totalorder %v2045_v42, %v2035_v19  ;;  %vm722_vm15 = vcmp.ne.s32.totalorder %v2048_v43, %v2035_v19  ;;  %v687_v31 = vadd.s32 48, %v2029_v15  ;;  %v688_v32 = vadd.s32 56, %v2029_v15 }
 0x11c   : > { %v752_v28 = vsel %vm720_vm14, %v2003_v41, 0.0  ;;  %v754_v30 = vsel %vm722_vm15, %v1966_v21, 0.0  ;;  %vm719_vm0 = vcmp.ne.s32.totalorder %v2055_v5, %v2035_v19  ;;  %vm721_vm11 = vcmp.ne.s32.totalorder %v2062_v7, %v2035_v19 }
 0x11d   : > { %770 = vadd.xlane.f32.xlu1 %v752_v28  ;;  %774 = vadd.xlane.f32.xlu2 %v754_v30  ;;  %vm723_vm12 = vcmp.ne.s32.totalorder %v2065_v17, %v2035_v19  ;;  %v689_v40 = vadd.s32 64, %v2029_v15  ;;  %v751_v44 = vsel %vm719_vm0, %v1983_v29, 0.0  ;;  %v2089_v28 = vadd.s32 %v2026_v6, %v687_v31 }
 0x11e   : > { %v753_v30 = vsel %vm721_vm11, %v2014_v48, 0.0  ;;  %v755_v21 = vsel %vm723_vm12, %v1988_v33, 0.0  ;;  %v2100_v16 = vadd.s32 %v2026_v6, %v688_v32  ;;  %v690_v31 = vadd.s32 72, %v2029_v15 }
 0x11f   : > { %v2103_v41 = vadd.s32 %v2026_v6, %v689_v40  ;;  %vm2506_vm13 = vcmp.ne.s32.totalorder %v2089_v28, %v2035_v19  ;;  %v692_v32 = vadd.s32 88, %v2029_v15 }
 0x120   : > { %vm2507_vm8 = vcmp.ne.s32.totalorder %v2100_v16, %v2035_v19  ;;  %v707_v40 = vadd.s32 %v2026_v6, %v690_v31  ;;  %v693_v31 = vadd.s32 96, %v2029_v15 }
 0x121   : > { %vm2512_vm9 = vcmp.ne.s32.totalorder %v2103_v41, %v2035_v19  ;;  %v2129_v48 = vadd.s32 %v2026_v6, %v692_v32 }
 0x122   : > { %v758_v33 = vsel %vm2512_vm9, %v1952_v12, 0.0  ;;  %vm2511_vm10 = vcmp.ne.s32.totalorder %v707_v40, %v2035_v19  ;;  %v710_v32 = vadd.s32 %v2026_v6, %v693_v31  ;;  %v696_v31 = vadd.s32 120, %v2029_v15 }
 0x123   : > { %768 = vadd.xlane.f32.xlu0 %v751_v44  ;;  %v691_v44 = vadd.s32 80, %v2029_v15 }
 0x125   : > { %772 = vadd.xlane.f32.xlu1 %v753_v30  ;;  %776 = vadd.xlane.f32.xlu2 %v755_v21  ;;  %v756_v21 = vsel %vm2506_vm13, %v2008_v45, 0.0  ;;  %v757_v30 = vsel %vm2507_vm8, %v2016_v49, 0.0  ;;  %v708_v29 = vadd.s32 %v2026_v6, %v691_v44  ;;  %vm2515_vm8 = vcmp.ne.s32.totalorder %v2129_v48, %v2035_v19 }
 0x126   : > { %v694_v45 = vadd.s32 104, %v2029_v15  ;;  %v759_v44 = vsel %vm2511_vm10, %v1976_v25, 0.0  ;;  %vm2516_vm10 = vcmp.ne.s32.totalorder %v710_v32, %v2035_v19 }
 0x127   : > { %vm2513_vm13 = vcmp.ne.s32.totalorder %v708_v29, %v2035_v19  ;;  %v762_v25 = vsel %vm2516_vm10, %v1970_v22, 0.0  ;;  %vm847_vm10 = vmand %vm654_vm4, %vm718_vm1 }
 0x128   : > { %v711_v12 = vadd.s32 %v2026_v6, %v694_v45  ;;  %vm849_vm1 = vmand %vm656_vm3, %vm720_vm14  ;;  %vm2534_vm14 = vcmp.eq.s32.totalorder %v1908_v59, %v1874_v50 }
 0x129   : > { %v865_v18 = vsel %vm849_vm1, %v1978_v26, 0.0  ;;  %vm2535_vm1 = vcmp.ne.s32.totalorder %v2100_v16, %v2035_v19 }
 0x12a   : > { %vm2517_vm9 = vcmp.ne.s32.totalorder %v711_v12, %v2035_v19 }
 0x12b   : > { %778 = vadd.xlane.f32.xlu0 %v756_v21  ;;  %v695_v21 = vadd.s32 112, %v2029_v15  ;;  %v763_v45 = vsel %vm2517_vm9, %v1990_v34, 0.0  ;;  %vm848_vm9 = vmand %vm655_vm7, %vm719_vm0 }
 0x12c   : > { %v864_v15 = vsel %vm848_vm9, %v1954_v13, 0.0  ;;  %vm850_vm0 = vmand %vm657_vm6, %vm721_vm11  ;;  %vm2533_vm11 = vcmp.ne.s32.totalorder %v2089_v28, %v2035_v19 }
 0x12d   : > { %780 = vadd.xlane.f32.xlu1 %v757_v30  ;;  %782 = vadd.xlane.f32.xlu2 %v758_v33  ;;  %v760_v33 = vsel %vm2513_vm13, %v1996_v37, 0.0  ;;  %v761_v30 = vsel %vm2515_vm8, %v2012_v47, 0.0  ;;  %v712_v49 = vadd.s32 %v2026_v6, %v695_v21  ;;  %vm851_vm9 = vmand %vm658_vm2, %vm722_vm15  ;;  %v866_v42 = vsel %vm850_vm0, %v1998_v38, 0.0 }
 0x12e   : > { %v867_v5 = vsel %vm851_vm9, %v1934_v3, 0.0  ;;  %vm853_vm15 = vmand %vm2534_vm14, %vm2533_vm11  ;;  %vm2536_vm0 = vcmp.eq.s32.totalorder %v1904_v58, %v1874_v50  ;;  %vm2538_vm11 = vcmp.eq.s32.totalorder %v1900_v57, %v1874_v50 }
 0x12f   : > { %vm732_vm13 = vcmp.ne.s32.totalorder %v712_v49, %v2035_v19  ;;  %vm854_vm9 = vmand %vm2536_vm0, %vm2535_vm1  ;;  %v869_v7 = vsel %vm853_vm15, %v1980_v27, 0.0  ;;  %vm2540_vm1 = vcmp.eq.s32.totalorder %v1920_v62, %v1874_v50  ;;  %vm2541_vm15 = vcmp.ne.s32.totalorder %v708_v29, %v2035_v19  ;;  %v736_v49 = vld [vmem:[#allocation2 + $0x10] sm:$0xff] }
 0x130   : > { %v764_v21 = vsel %vm732_vm13, %v2010_v46, 0.0  ;;  %v870_v17 = vsel %vm854_vm9, %v2000_v39, 0.0  ;;  %vm2542_vm0 = vcmp.eq.s32.totalorder %v1916_v61, %v1874_v50 }
 0x131   : > { %vm857_vm9 = vmand %vm2542_vm0, %vm2541_vm15  ;;  %vm2546_vm15 = vcmp.eq.s32.totalorder %v1942_v9, %v1874_v50  ;;  %vm2548_vm0 = vcmp.eq.s32.totalorder %v1940_v8, %v1874_v50 }
 0x132   : > { %v873_v28 = vsel %vm857_vm9, %v1972_v23, 0.0 }
 0x133   : > { %784 = vadd.xlane.f32.xlu0 %v759_v44  ;;  %v713_v44 = vadd.s32 %v2026_v6, %v696_v31  ;;  %v863_v6 = vsel %vm847_vm10, %v1932_v2, 0.0  ;;  %vm852_vm10 = vmand %vm2518_vm5, %vm723_vm12  ;;  %vm2537_vm12 = vcmp.ne.s32.totalorder %v2103_v41, %v2035_v19  ;;  %vm2539_vm5 = vcmp.ne.s32.totalorder %v707_v40, %v2035_v19  ;;  %v738_v31 = vld [vmem:[#allocation2 + $0x20] sm:$0xff] }
 0x134   : > { %v868_v43 = vsel %vm852_vm10, %v1956_v14, 0.0  ;;  %vm855_vm14 = vmand %vm2538_vm11, %vm2537_vm12  ;;  %vm2543_vm12 = vcmp.ne.s32.totalorder %v2129_v48, %v2035_v19 }
 0x135   : > { %786 = vadd.xlane.f32.xlu1 %v760_v33  ;;  %788 = vadd.xlane.f32.xlu2 %v761_v30  ;;  %vm733_vm8 = vcmp.ne.s32.totalorder %v713_v44, %v2035_v19  ;;  %vm856_vm10 = vmand %vm2540_vm1, %vm2539_vm5  ;;  %v871_v16 = vsel %vm855_vm14, %v1928_v0, 0.0  ;;  %vm2544_vm5 = vcmp.eq.s32.totalorder %v1910_v60, %v1874_v50  ;;  %vm2545_vm1 = vcmp.ne.s32.totalorder %v710_v32, %v2035_v19  ;;  %v734_v33 = vld [vmem:[#allocation2] sm:$0xff] }
 0x136   : > { %v872_v41 = vsel %vm856_vm10, %v1948_v10, 0.0  ;;  %vm858_vm11 = vmand %vm2544_vm5, %vm2543_vm12  ;;  %vm2547_vm10 = vcmp.ne.s32.totalorder %v711_v12, %v2035_v19  ;;  %vm2549_vm12 = vcmp.eq.s32.totalorder %v1922_v63, %v1874_v50 }
 0x137   : > { %vm859_vm14 = vmand %vm2546_vm15, %vm2545_vm1  ;;  %v874_v29 = vsel %vm858_vm11, %v1992_v35, 0.0  ;;  %vm2550_vm1 = vcmp.eq.s32.totalorder %v1964_v20, %v1874_v50  ;;  %vm814_vm11 = vcmask 7168  }
 0x138   : > { %vm860_vm9 = vmand %vm2548_vm0, %vm2547_vm10  ;;  %v875_v48 = vsel %vm859_vm14, %v1930_v1, 0.0 }
 0x139   : > { %v876_v40 = vsel %vm860_vm9, %v1950_v11, 0.0  ;;  %vm861_vm5 = vmand %vm2549_vm12, %vm732_vm13 }
 0x13a   : > { %vm862_vm15 = vmand %vm2550_vm1, %vm733_vm8  ;;  %v877_v12 = vsel %vm861_vm5, %v1974_v24, 0.0 }
 0x13b   : > { %790 = vadd.xlane.f32.xlu0 %v762_v25  ;;  %v765_v25 = vsel %vm733_vm8, %v2018_v4, 0.0  ;;  %v878_v32 = vsel %vm862_vm15, %v1994_v36, 0.0 }
 0x13d   : > { %792 = vadd.xlane.f32.xlu1 %v763_v45  ;;  %794 = vadd.xlane.f32.xlu2 %v764_v21 }
 0x143   : > { %796 = vadd.xlane.f32.xlu0 %v765_v25 }
 0x145   : > { %879 = vadd.xlane.f32.xlu1 %v863_v6  ;;  %881 = vadd.xlane.f32.xlu2 %v864_v15  ;;  %v735_v6 = vld [vmem:[#allocation2 + $0x8] sm:$0xff]  ;;  %v737_v15 = vld [vmem:[#allocation2 + $0x18] sm:$0xff] }
 0x14b   : > { %883 = vadd.xlane.f32.xlu0 %v865_v18 }
 0x14d   : > { %885 = vadd.xlane.f32.xlu1 %v866_v42  ;;  %887 = vadd.xlane.f32.xlu2 %v867_v5  ;;  %v739_v42 = vld [vmem:[#allocation2 + $0x28] sm:$0xff] }
 0x153   : > { %889 = vadd.xlane.f32.xlu0 %v868_v43 }
 0x155   : > { %891 = vadd.xlane.f32.xlu1 %v869_v7  ;;  %893 = vadd.xlane.f32.xlu2 %v870_v17 }
 0x15b   : > { %895 = vadd.xlane.f32.xlu0 %v871_v16 }
 0x15d   : > { %897 = vadd.xlane.f32.xlu1 %v872_v41  ;;  %899 = vadd.xlane.f32.xlu2 %v873_v28  ;;  %v740_v41 = vld [vmem:[#allocation2 + $0x30] sm:$0xff]  ;;  %v741_v28 = vld [vmem:[#allocation2 + $0x38] sm:$0xff] }
 0x163   : > { %901 = vadd.xlane.f32.xlu0 %v874_v29 }
 0x165   : > { %903 = vadd.xlane.f32.xlu1 %v875_v48  ;;  %905 = vadd.xlane.f32.xlu2 %v876_v40  ;;  %v742_v48 = vld [vmem:[#allocation2 + $0x40] sm:$0xff] }
 0x16b   : > { %907 = vadd.xlane.f32.xlu0 %v877_v12 }
 0x16d   : > { %909 = vadd.xlane.f32.xlu1 %v878_v32 }
 0x18e   : > { %v767_v30 = vpop.xlane.xlu0 %766 }
 0x18f   : > { %v798_v45 = vadd.f32 %v767_v30, %v734_v33 }
 0x190   : > { %v771_v21 = vpop.xlane.xlu1 %770  ;;  %v775_v25 = vpop.xlane.xlu2 %774 }
 0x191   : > { %815 = vst.msk [vmem:[#allocation2] sm:$0xff] %vm814_vm11, %v798_v45  ;;  %v800_v19 = vadd.f32 %v771_v21, %v736_v49  ;;  %v802_v44 = vadd.f32 %v775_v25, %v738_v31  ;;  %v743_v49 = vld [vmem:[#allocation2 + $0x48] sm:$0xff]  ;;  %v744_v31 = vld [vmem:[#allocation2 + $0x50] sm:$0xff]  ;;  %v745_v21 = vld [vmem:[#allocation2 + $0x58] sm:$0xff] }
 0x193   : > { %817 = vst.msk [vmem:[#allocation2 + $0x10] sm:$0xff] %vm814_vm11, %v800_v19 }
 0x194   : > { %819 = vst.msk [vmem:[#allocation2 + $0x20] sm:$0xff] %vm814_vm11, %v802_v44 }
 0x196   : > { %v769_v18 = vpop.xlane.xlu0 %768 }
 0x197   : > { %v799_v5 = vadd.f32 %v769_v18, %v735_v6  ;;  %v746_v18 = vld [vmem:[#allocation2 + $0x60] sm:$0xff] }
 0x198   : > { %v773_v43 = vpop.xlane.xlu1 %772  ;;  %v777_v7 = vpop.xlane.xlu2 %776 }
 0x199   : > { %v801_v17 = vadd.f32 %v773_v43, %v737_v15  ;;  %816 = vst.msk [vmem:[#allocation2 + $0x8] sm:$0xff] %vm814_vm11, %v799_v5  ;;  %v803_v16 = vadd.f32 %v777_v7, %v739_v42  ;;  %v747_v42 = vld [vmem:[#allocation2 + $0x68] sm:$0xff]  ;;  %v748_v43 = vld [vmem:[#allocation2 + $0x70] sm:$0xff] }
 0x19b   : > { %818 = vst.msk [vmem:[#allocation2 + $0x18] sm:$0xff] %vm814_vm11, %v801_v17 }
 0x19c   : > { %820 = vst.msk [vmem:[#allocation2 + $0x28] sm:$0xff] %vm814_vm11, %v803_v16 }
 0x19e   : > { %v779_v29 = vpop.xlane.xlu0 %778 }
 0x19f   : > { %v804_v40 = vadd.f32 %v779_v29, %v740_v41  ;;  %v749_v29 = vld [vmem:[#allocation2 + $0x78] sm:$0xff] }
 0x1a0   : > { %v781_v12 = vpop.xlane.xlu1 %780  ;;  %v783_v32 = vpop.xlane.xlu2 %782 }
 0x1a1   : > { %v805_v33 = vadd.f32 %v781_v12, %v741_v28  ;;  %821 = vst.msk [vmem:[#allocation2 + $0x30] sm:$0xff] %vm814_vm11, %v804_v40  ;;  %v806_v30 = vadd.f32 %v783_v32, %v742_v48  ;;  %v831_v48 = vld [vmem:[#allocation3] sm:$0xff]  ;;  %v832_v12 = vld [vmem:[#allocation3 + $0x8] sm:$0xff] }
 0x1a3   : > { %822 = vst.msk [vmem:[#allocation2 + $0x38] sm:$0xff] %vm814_vm11, %v805_v33 }
 0x1a4   : > { %823 = vst.msk [vmem:[#allocation2 + $0x40] sm:$0xff] %vm814_vm11, %v806_v30 }
 0x1a6   : > { %v785_v45 = vpop.xlane.xlu0 %784 }
 0x1a7   : > { %v807_v25 = vadd.f32 %v785_v45, %v743_v49  ;;  %v833_v45 = vld [vmem:[#allocation3 + $0x10] sm:$0xff] }
 0x1a8   : > { %v787_v19 = vpop.xlane.xlu1 %786  ;;  %v789_v44 = vpop.xlane.xlu2 %788 }
 0x1a9   : > { %v808_v6 = vadd.f32 %v787_v19, %v744_v31  ;;  %824 = vst.msk [vmem:[#allocation2 + $0x48] sm:$0xff] %vm814_vm11, %v807_v25  ;;  %v809_v15 = vadd.f32 %v789_v44, %v745_v21  ;;  %v834_v21 = vld [vmem:[#allocation3 + $0x18] sm:$0xff]  ;;  %v835_v19 = vld [vmem:[#allocation3 + $0x20] sm:$0xff] }
 0x1ab   : > { %825 = vst.msk [vmem:[#allocation2 + $0x50] sm:$0xff] %vm814_vm11, %v808_v6 }
 0x1ac   : > { %826 = vst.msk [vmem:[#allocation2 + $0x58] sm:$0xff] %vm814_vm11, %v809_v15 }
 0x1ae   : > { %v791_v5 = vpop.xlane.xlu0 %790 }
 0x1af   : > { %v810_v7 = vadd.f32 %v791_v5, %v746_v18  ;;  %v836_v5 = vld [vmem:[#allocation3 + $0x28] sm:$0xff] }
 0x1b0   : > { %v793_v17 = vpop.xlane.xlu1 %792  ;;  %v795_v16 = vpop.xlane.xlu2 %794 }
 0x1b1   : > { %v811_v41 = vadd.f32 %v793_v17, %v747_v42  ;;  %827 = vst.msk [vmem:[#allocation2 + $0x60] sm:$0xff] %vm814_vm11, %v810_v7  ;;  %v812_v28 = vadd.f32 %v795_v16, %v748_v43  ;;  %v837_v43 = vld [vmem:[#allocation3 + $0x30] sm:$0xff]  ;;  %v838_v17 = vld [vmem:[#allocation3 + $0x38] sm:$0xff] }
 0x1b3   : > { %828 = vst.msk [vmem:[#allocation2 + $0x68] sm:$0xff] %vm814_vm11, %v811_v41 }
 0x1b4   : > { %829 = vst.msk [vmem:[#allocation2 + $0x70] sm:$0xff] %vm814_vm11, %v812_v28 }
 0x1b6   : > { %v797_v40 = vpop.xlane.xlu0 %796 }
 0x1b7   : > { %v813_v32 = vadd.f32 %v797_v40, %v749_v29  ;;  %v839_v40 = vld [vmem:[#allocation3 + $0x40] sm:$0xff] }
 0x1b8   : > { %v880_v33 = vpop.xlane.xlu1 %879  ;;  %v882_v30 = vpop.xlane.xlu2 %881 }
 0x1b9   : > { %v911_v49 = vadd.f32 %v880_v33, %v831_v48  ;;  %830 = vst.msk [vmem:[#allocation2 + $0x78] sm:$0xff] %vm814_vm11, %v813_v32  ;;  %v912_v31 = vadd.f32 %v882_v30, %v832_v12  ;;  %v840_v12 = vld [vmem:[#allocation3 + $0x48] sm:$0xff]  ;;  %v841_v33 = vld [vmem:[#allocation3 + $0x50] sm:$0xff] }
 0x1bb   : > { %927 = vst.msk [vmem:[#allocation3] sm:$0xff] %vm814_vm11, %v911_v49 }
 0x1bc   : > { %928 = vst.msk [vmem:[#allocation3 + $0x8] sm:$0xff] %vm814_vm11, %v912_v31 }
 0x1be   : > { %v884_v25 = vpop.xlane.xlu0 %883 }
 0x1bf   : > { %v913_v44 = vadd.f32 %v884_v25, %v833_v45  ;;  %v842_v25 = vld [vmem:[#allocation3 + $0x58] sm:$0xff] }
 0x1c0   : > { %v886_v6 = vpop.xlane.xlu1 %885  ;;  %v888_v15 = vpop.xlane.xlu2 %887 }
 0x1c1   : > { %v914_v18 = vadd.f32 %v886_v6, %v834_v21  ;;  %929 = vst.msk [vmem:[#allocation3 + $0x10] sm:$0xff] %vm814_vm11, %v913_v44  ;;  %v915_v42 = vadd.f32 %v888_v15, %v835_v19  ;;  %v843_v19 = vld [vmem:[#allocation3 + $0x60] sm:$0xff]  ;;  %v844_v6 = vld [vmem:[#allocation3 + $0x68] sm:$0xff] }
 0x1c3   : > { %930 = vst.msk [vmem:[#allocation3 + $0x18] sm:$0xff] %vm814_vm11, %v914_v18 }
 0x1c4   : > { %931 = vst.msk [vmem:[#allocation3 + $0x20] sm:$0xff] %vm814_vm11, %v915_v42 }
 0x1c6   : > { %v890_v7 = vpop.xlane.xlu0 %889 }
 0x1c7   : > { %v916_v16 = vadd.f32 %v890_v7, %v836_v5  ;;  %v845_v7 = vld [vmem:[#allocation3 + $0x70] sm:$0xff] }
 0x1c8   : > { %v892_v41 = vpop.xlane.xlu1 %891  ;;  %v894_v28 = vpop.xlane.xlu2 %893 }
 0x1c9   : > { %v917_v29 = vadd.f32 %v892_v41, %v837_v43  ;;  %932 = vst.msk [vmem:[#allocation3 + $0x28] sm:$0xff] %vm814_vm11, %v916_v16  ;;  %v918_v48 = vadd.f32 %v894_v28, %v838_v17  ;;  %v846_v17 = vld [vmem:[#allocation3 + $0x78] sm:$0xff] }
 0x1cb   : > { %933 = vst.msk [vmem:[#allocation3 + $0x30] sm:$0xff] %vm814_vm11, %v917_v29 }
 0x1cc   : > { %934 = vst.msk [vmem:[#allocation3 + $0x38] sm:$0xff] %vm814_vm11, %v918_v48 }
 0x1ce   : > { %v896_v32 = vpop.xlane.xlu0 %895 }
 0x1cf   : > { %v919_v30 = vadd.f32 %v896_v32, %v839_v40 }
 0x1d0   : > { %v898_v49 = vpop.xlane.xlu1 %897  ;;  %v900_v31 = vpop.xlane.xlu2 %899 }
 0x1d1   : > { %v920_v45 = vadd.f32 %v898_v49, %v840_v12  ;;  %935 = vst.msk [vmem:[#allocation3 + $0x40] sm:$0xff] %vm814_vm11, %v919_v30  ;;  %v921_v21 = vadd.f32 %v900_v31, %v841_v33 }
 0x1d3   : > { %936 = vst.msk [vmem:[#allocation3 + $0x48] sm:$0xff] %vm814_vm11, %v920_v45 }
 0x1d4   : > { %937 = vst.msk [vmem:[#allocation3 + $0x50] sm:$0xff] %vm814_vm11, %v921_v21 }
 0x1d6   : > { %v902_v44 = vpop.xlane.xlu0 %901 }
 0x1d7   : > { %v922_v15 = vadd.f32 %v902_v44, %v842_v25 }
 0x1d8   : > { %v904_v18 = vpop.xlane.xlu1 %903  ;;  %v906_v42 = vpop.xlane.xlu2 %905 }
 0x1d9   : > { %v923_v5 = vadd.f32 %v904_v18, %v843_v19  ;;  %938 = vst.msk [vmem:[#allocation3 + $0x58] sm:$0xff] %vm814_vm11, %v922_v15  ;;  %v924_v43 = vadd.f32 %v906_v42, %v844_v6 }
 0x1db   : > { %939 = vst.msk [vmem:[#allocation3 + $0x60] sm:$0xff] %vm814_vm11, %v923_v5 }
 0x1dc   : > { %940 = vst.msk [vmem:[#allocation3 + $0x68] sm:$0xff] %vm814_vm11, %v924_v43 }
 0x1de   : > { %v908_v16 = vpop.xlane.xlu0 %907 }
 0x1df   : > { %v925_v41 = vadd.f32 %v908_v16, %v845_v7 }
 0x1e0   : > { %v910_v28 = vpop.xlane.xlu1 %909 }
 0x1e1   : > { %v926_v29 = vadd.f32 %v910_v28, %v846_v17  ;;  %941 = vst.msk [vmem:[#allocation3 + $0x70] sm:$0xff] %vm814_vm11, %v925_v41 }
 0x1e3   : > { %942 = vst.msk [vmem:[#allocation3 + $0x78] sm:$0xff] %vm814_vm11, %v926_v29 }
 0x1e4 PF: > { %945 = sbr.rel (!%p676_p1) target bundleno = 685 (0x2ad), region = 90  ;;  %v2551_v48 = vld [vmem:[#allocation11_spill] sm:$0xff] (%p676_p1)  ;;  %v2552_v40 = vld [vmem:[#allocation6_spill] sm:$0xff] (%p676_p1)  ;;  %v2555_v33 = vld [vmem:[#allocation9_spill] sm:$0xff] (%p676_p1)  ;;  %v1043_v25 = vsel (%p676_p1), %vm654_vm4, %v1932_v2, 0.0  ;;  %v1046_v53 = vsel (%p676_p1), %vm657_vm6, %v1998_v38, 0.0  ;;  %vm2561_vm4 = vcmp.eq.s32.totalorder (%p676_p1), %v1888_v54, %v1874_v50  ;;  %vm2563_vm6 = vcmp.eq.s32.totalorder (%p676_p1), %v1904_v58, %v1874_v50 }
 0x1e5   : > { %966 = vadd.xlane.f32.xlu1 (%p676_p1), %v2551_v48  ;;  %962 = vadd.xlane.f32.xlu0 (%p676_p1), %v2552_v40  ;;  %v2553_v12 = vld [vmem:[#allocation7_spill] sm:$0xff] (%p676_p1)  ;;  %v2556_v30 = vld [vmem:[#allocation10_spill] sm:$0xff] (%p676_p1)  ;;  %v2558_v31 = vld [vmem:[#allocation12_spill] sm:$0xff] (%p676_p1)  ;;  %v1047_v56 = vsel (%p676_p1), %vm658_vm2, %v1934_v3, 0.0  ;;  %v1048_v2 = vsel (%p676_p1), %vm2561_vm4, %v1956_v14, 0.0  ;;  %v1050_v55 = vsel (%p676_p1), %vm2563_vm6, %v2000_v39, 0.0  ;;  %vm2564_vm2 = vcmp.eq.s32.totalorder (%p676_p1), %v1900_v57, %v1874_v50 }
 0x1e6   : > { %970 = vadd.xlane.f32.xlu2 (%p676_p1), %v2553_v12  ;;  %v2559_v45 = vld [vmem:[#allocation5_spill] sm:$0xff] (%p676_p1)  ;;  %v2560_v21 = vld [vmem:[#allocation8_spill] sm:$0xff] (%p676_p1)  ;;  %v1051_v51 = vsel (%p676_p1), %vm2564_vm2, %v1928_v0, 0.0  ;;  %vm2566_vm8 = vcmp.eq.s32.totalorder (%p676_p1), %v1916_v61, %v1874_v50  ;;  %vm2567_vm13 = vcmp.eq.s32.totalorder (%p676_p1), %v1910_v60, %v1874_v50  ;;  %vm2568_vm14 = vcmp.eq.s32.totalorder (%p676_p1), %v1942_v9, %v1874_v50  ;;  %v948_v0 = vld [vmem:[#allocation2 + $0x10] sm:$0xff] (%p676_p1) }
 0x1e7   : > { %v1054_v58 = vsel (%p676_p1), %vm2567_vm13, %v1992_v35, 0.0  ;;  %v1055_v57 = vsel (%p676_p1), %vm2568_vm14, %v1930_v1, 0.0  ;;  %vm2569_vm10 = vcmp.eq.s32.totalorder (%p676_p1), %v1940_v8, %v1874_v50  ;;  %vm2570_vm0 = vcmp.eq.s32.totalorder (%p676_p1), %v1922_v63, %v1874_v50  ;;  %v946_v1 = vld [vmem:[#allocation2] sm:$0xff] (%p676_p1)  ;;  %v947_v63 = vld [vmem:[#allocation2 + $0x8] sm:$0xff] (%p676_p1)  ;;  %v952_v38 = vld [vmem:[#allocation2 + $0x30] sm:$0xff] (%p676_p1) }
 0x1e8   : > { %v1057_v61 = vsel (%p676_p1), %vm2570_vm0, %v1974_v24, 0.0  ;;  %vm2571_vm9 = vcmp.eq.s32.totalorder (%p676_p1), %v1964_v20, %v1874_v50  ;;  %v950_v3 = vld [vmem:[#allocation2 + $0x20] sm:$0xff] (%p676_p1)  ;;  %vm1010_vm12 = vcmask (%p676_p1), 7168   ;;  %v951_v20 = vld [vmem:[#allocation2 + $0x28] sm:$0xff] (%p676_p1)  ;;  %v956_v15 = vld [vmem:[#allocation2 + $0x50] sm:$0xff] (%p676_p1) }
 0x1e9   : > { %v2554_v32 = vld [vmem:[#allocation13_spill] sm:$0xff]  ;;  %v1058_v60 = vsel %vm2571_vm9, %v1994_v36, 0.0  ;;  %v953_v36 = vld [vmem:[#allocation2 + $0x38] sm:$0xff]  ;;  %v955_v18 = vld [vmem:[#allocation2 + $0x48] sm:$0xff] }
 0x1ea   : > { %v2557_v49 = vld [vmem:[#allocation14_spill] sm:$0xff]  ;;  %v954_v39 = vld [vmem:[#allocation2 + $0x40] sm:$0xff]  ;;  %v957_v42 = vld [vmem:[#allocation2 + $0x58] sm:$0xff] }
 0x1eb   : > { %v959_v28 = vld [vmem:[#allocation2 + $0x68] sm:$0xff]  ;;  %v958_v29 = vld [vmem:[#allocation2 + $0x60] sm:$0xff]  ;;  %v960_v48 = vld [vmem:[#allocation2 + $0x70] sm:$0xff] }
 0x1ed   : > { %968 = vadd.xlane.f32.xlu1 %v2554_v32  ;;  %964 = vadd.xlane.f32.xlu0 %v2555_v33 }
 0x1ee   : > { %972 = vadd.xlane.f32.xlu2 %v2556_v30 }
 0x1f5   : > { %976 = vadd.xlane.f32.xlu1 %v2557_v49  ;;  %974 = vadd.xlane.f32.xlu0 %v2558_v31  ;;  %v961_v31 = vld [vmem:[#allocation2 + $0x78] sm:$0xff] }
 0x1f6   : > { %978 = vadd.xlane.f32.xlu2 %v2559_v45  ;;  %v1027_v45 = vld [vmem:[#allocation3] sm:$0xff] }
 0x1fd   : > { %982 = vadd.xlane.f32.xlu1 %v1996_v37  ;;  %980 = vadd.xlane.f32.xlu0 %v2560_v21  ;;  %v1044_v37 = vsel %vm655_vm7, %v1954_v13, 0.0  ;;  %vm2565_vm7 = vcmp.eq.s32.totalorder %v1920_v62, %v1874_v50  ;;  %v1056_v62 = vsel %vm2569_vm10, %v1950_v11, 0.0  ;;  %v1028_v21 = vld [vmem:[#allocation3 + $0x8] sm:$0xff] }
 0x1fe   : > { %984 = vadd.xlane.f32.xlu2 %v2012_v47  ;;  %v1052_v54 = vsel %vm2565_vm7, %v1948_v10, 0.0 }
 0x205   : > { %988 = vadd.xlane.f32.xlu1 %v1990_v34  ;;  %986 = vadd.xlane.f32.xlu0 %v1970_v22  ;;  %v1045_v22 = vsel %vm656_vm3, %v1978_v26, 0.0  ;;  %vm2562_vm3 = vcmp.eq.s32.totalorder %v1908_v59, %v1874_v50  ;;  %v1053_v59 = vsel %vm2566_vm8, %v1972_v23, 0.0  ;;  %v949_v50 = vld [vmem:[#allocation2 + $0x18] sm:$0xff] }
 0x206   : > { %990 = vadd.xlane.f32.xlu2 %v2010_v46  ;;  %v1049_v52 = vsel %vm2562_vm3, %v1980_v27, 0.0 }
 0x20d   : > { %992 = vadd.xlane.f32.xlu0 %v2018_v4  ;;  %1059 = vadd.xlane.f32.xlu1 %v1043_v25 }
 0x20e   : > { %1061 = vadd.xlane.f32.xlu2 %v1044_v37 }
 0x215   : > { %1063 = vadd.xlane.f32.xlu0 %v1045_v22  ;;  %1065 = vadd.xlane.f32.xlu1 %v1046_v53 }
 0x216   : > { %1067 = vadd.xlane.f32.xlu2 %v1047_v56 }
 0x21d   : > { %1069 = vadd.xlane.f32.xlu0 %v1048_v2  ;;  %1071 = vadd.xlane.f32.xlu1 %v1049_v52  ;;  %v1029_v52 = vld [vmem:[#allocation3 + $0x10] sm:$0xff] }
 0x21e   : > { %1073 = vadd.xlane.f32.xlu2 %v1050_v55  ;;  %v1030_v55 = vld [vmem:[#allocation3 + $0x18] sm:$0xff] }
 0x225   : > { %1075 = vadd.xlane.f32.xlu0 %v1051_v51  ;;  %1077 = vadd.xlane.f32.xlu1 %v1052_v54  ;;  %v1031_v51 = vld [vmem:[#allocation3 + $0x20] sm:$0xff] }
 0x226   : > { %1079 = vadd.xlane.f32.xlu2 %v1053_v59 }
 0x22d   : > { %1081 = vadd.xlane.f32.xlu0 %v1054_v58  ;;  %1083 = vadd.xlane.f32.xlu1 %v1055_v57 }
 0x22e   : > { %1085 = vadd.xlane.f32.xlu2 %v1056_v62 }
 0x235   : > { %1087 = vadd.xlane.f32.xlu0 %v1057_v61  ;;  %1089 = vadd.xlane.f32.xlu1 %v1058_v60  ;;  %v1032_v60 = vld [vmem:[#allocation3 + $0x28] sm:$0xff] }
 0x258   : > { %v967_v8 = vpop.xlane.xlu1 %966  ;;  %v963_v9 = vpop.xlane.xlu0 %962 }
 0x259   : > { %v996_v10 = vadd.f32 %v967_v8, %v948_v0  ;;  %v994_v11 = vadd.f32 %v963_v9, %v946_v1  ;;  %v971_v13 = vpop.xlane.xlu2 %970  ;;  %v1033_v0 = vld [vmem:[#allocation3 + $0x30] sm:$0xff]  ;;  %v1034_v1 = vld [vmem:[#allocation3 + $0x38] sm:$0xff] }
 0x25a   : > { %v998_v14 = vadd.f32 %v971_v13, %v950_v3 }
 0x25b   : > { %1013 = vst.msk [vmem:[#allocation2 + $0x10] sm:$0xff] %vm1010_vm12, %v996_v10 }
 0x25c   : > { %1011 = vst.msk [vmem:[#allocation2] sm:$0xff] %vm1010_vm12, %v994_v11 }
 0x25d   : > { %1015 = vst.msk [vmem:[#allocation2 + $0x20] sm:$0xff] %vm1010_vm12, %v998_v14  ;;  %v1035_v14 = vld [vmem:[#allocation3 + $0x40] sm:$0xff] }
 0x260   : > { %v969_v23 = vpop.xlane.xlu1 %968  ;;  %v965_v24 = vpop.xlane.xlu0 %964 }
 0x261   : > { %v997_v26 = vadd.f32 %v969_v23, %v949_v50  ;;  %v995_v27 = vadd.f32 %v965_v24, %v947_v63  ;;  %v973_v34 = vpop.xlane.xlu2 %972  ;;  %v1036_v50 = vld [vmem:[#allocation3 + $0x48] sm:$0xff]  ;;  %v1037_v63 = vld [vmem:[#allocation3 + $0x50] sm:$0xff] }
 0x262   : > { %v999_v35 = vadd.f32 %v973_v34, %v951_v20 }
 0x263   : > { %1014 = vst.msk [vmem:[#allocation2 + $0x18] sm:$0xff] %vm1010_vm12, %v997_v26 }
 0x264   : > { %1012 = vst.msk [vmem:[#allocation2 + $0x8] sm:$0xff] %vm1010_vm12, %v995_v27 }
 0x265   : > { %1016 = vst.msk [vmem:[#allocation2 + $0x28] sm:$0xff] %vm1010_vm12, %v999_v35  ;;  %v1038_v35 = vld [vmem:[#allocation3 + $0x58] sm:$0xff] }
 0x268   : > { %v977_v46 = vpop.xlane.xlu1 %976  ;;  %v975_v47 = vpop.xlane.xlu0 %974 }
 0x269   : > { %v1001_v4 = vadd.f32 %v977_v46, %v953_v36  ;;  %v1000_v19 = vadd.f32 %v975_v47, %v952_v38  ;;  %v979_v44 = vpop.xlane.xlu2 %978  ;;  %v1039_v36 = vld [vmem:[#allocation3 + $0x60] sm:$0xff]  ;;  %v1040_v38 = vld [vmem:[#allocation3 + $0x68] sm:$0xff] }
 0x26a   : > { %v1002_v6 = vadd.f32 %v979_v44, %v954_v39 }
 0x26b   : > { %1018 = vst.msk [vmem:[#allocation2 + $0x38] sm:$0xff] %vm1010_vm12, %v1001_v4 }
 0x26c   : > { %1017 = vst.msk [vmem:[#allocation2 + $0x30] sm:$0xff] %vm1010_vm12, %v1000_v19 }
 0x26d   : > { %1019 = vst.msk [vmem:[#allocation2 + $0x40] sm:$0xff] %vm1010_vm12, %v1002_v6  ;;  %v1041_v6 = vld [vmem:[#allocation3 + $0x70] sm:$0xff] }
 0x270   : > { %v983_v5 = vpop.xlane.xlu1 %982  ;;  %v981_v43 = vpop.xlane.xlu0 %980 }
 0x271   : > { %v1004_v7 = vadd.f32 %v983_v5, %v956_v15  ;;  %v1003_v17 = vadd.f32 %v981_v43, %v955_v18  ;;  %v985_v16 = vpop.xlane.xlu2 %984  ;;  %v1042_v15 = vld [vmem:[#allocation3 + $0x78] sm:$0xff] }
 0x272   : > { %v1005_v41 = vadd.f32 %v985_v16, %v957_v42 }
 0x273   : > { %1021 = vst.msk [vmem:[#allocation2 + $0x50] sm:$0xff] %vm1010_vm12, %v1004_v7 }
 0x274   : > { %1020 = vst.msk [vmem:[#allocation2 + $0x48] sm:$0xff] %vm1010_vm12, %v1003_v17 }
 0x275   : > { %1022 = vst.msk [vmem:[#allocation2 + $0x58] sm:$0xff] %vm1010_vm12, %v1005_v41 }
 0x278   : > { %v989_v40 = vpop.xlane.xlu1 %988  ;;  %v987_v12 = vpop.xlane.xlu0 %986 }
 0x279   : > { %v1007_v32 = vadd.f32 %v989_v40, %v959_v28  ;;  %v1006_v33 = vadd.f32 %v987_v12, %v958_v29  ;;  %v991_v30 = vpop.xlane.xlu2 %990 }
 0x27a   : > { %v1008_v49 = vadd.f32 %v991_v30, %v960_v48 }
 0x27b   : > { %1024 = vst.msk [vmem:[#allocation2 + $0x68] sm:$0xff] %vm1010_vm12, %v1007_v32 }
 0x27c   : > { %1023 = vst.msk [vmem:[#allocation2 + $0x60] sm:$0xff] %vm1010_vm12, %v1006_v33 }
 0x27d   : > { %1025 = vst.msk [vmem:[#allocation2 + $0x70] sm:$0xff] %vm1010_vm12, %v1008_v49 }
 0x280   : > { %v993_v25 = vpop.xlane.xlu0 %992  ;;  %v1060_v37 = vpop.xlane.xlu1 %1059 }
 0x281   : > { %v1009_v22 = vadd.f32 %v993_v25, %v961_v31  ;;  %v1091_v53 = vadd.f32 %v1060_v37, %v1027_v45  ;;  %v1062_v56 = vpop.xlane.xlu2 %1061 }
 0x282   : > { %v1092_v2 = vadd.f32 %v1062_v56, %v1028_v21 }
 0x283   : > { %1026 = vst.msk [vmem:[#allocation2 + $0x78] sm:$0xff] %vm1010_vm12, %v1009_v22 }
 0x284   : > { %1107 = vst.msk [vmem:[#allocation3] sm:$0xff] %vm1010_vm12, %v1091_v53 }
 0x285   : > { %1108 = vst.msk [vmem:[#allocation3 + $0x8] sm:$0xff] %vm1010_vm12, %v1092_v2 }
 0x288   : > { %v1064_v54 = vpop.xlane.xlu0 %1063  ;;  %v1066_v59 = vpop.xlane.xlu1 %1065 }
 0x289   : > { %v1093_v58 = vadd.f32 %v1064_v54, %v1029_v52  ;;  %v1094_v57 = vadd.f32 %v1066_v59, %v1030_v55  ;;  %v1068_v62 = vpop.xlane.xlu2 %1067 }
 0x28a   : > { %v1095_v61 = vadd.f32 %v1068_v62, %v1031_v51 }
 0x28b   : > { %1109 = vst.msk [vmem:[#allocation3 + $0x10] sm:$0xff] %vm1010_vm12, %v1093_v58 }
 0x28c   : > { %1110 = vst.msk [vmem:[#allocation3 + $0x18] sm:$0xff] %vm1010_vm12, %v1094_v57 }
 0x28d   : > { %1111 = vst.msk [vmem:[#allocation3 + $0x20] sm:$0xff] %vm1010_vm12, %v1095_v61 }
 0x290   : > { %v1070_v3 = vpop.xlane.xlu0 %1069  ;;  %v1072_v8 = vpop.xlane.xlu1 %1071 }
 0x291   : > { %v1096_v9 = vadd.f32 %v1070_v3, %v1032_v60  ;;  %v1097_v10 = vadd.f32 %v1072_v8, %v1033_v0  ;;  %v1074_v11 = vpop.xlane.xlu2 %1073 }
 0x292   : > { %v1098_v13 = vadd.f32 %v1074_v11, %v1034_v1 }
 0x293   : > { %1112 = vst.msk [vmem:[#allocation3 + $0x28] sm:$0xff] %vm1010_vm12, %v1096_v9 }
 0x294   : > { %1113 = vst.msk [vmem:[#allocation3 + $0x30] sm:$0xff] %vm1010_vm12, %v1097_v10 }
 0x295   : > { %1114 = vst.msk [vmem:[#allocation3 + $0x38] sm:$0xff] %vm1010_vm12, %v1098_v13 }
 0x298   : > { %v1076_v20 = vpop.xlane.xlu0 %1075  ;;  %v1078_v23 = vpop.xlane.xlu1 %1077 }
 0x299   : > { %v1099_v24 = vadd.f32 %v1076_v20, %v1035_v14  ;;  %v1100_v26 = vadd.f32 %v1078_v23, %v1036_v50  ;;  %v1080_v27 = vpop.xlane.xlu2 %1079 }
 0x29a   : > { %v1101_v34 = vadd.f32 %v1080_v27, %v1037_v63 }
 0x29b   : > { %1115 = vst.msk [vmem:[#allocation3 + $0x40] sm:$0xff] %vm1010_vm12, %v1099_v24 }
 0x29c   : > { %1116 = vst.msk [vmem:[#allocation3 + $0x48] sm:$0xff] %vm1010_vm12, %v1100_v26 }
 0x29d   : > { %1117 = vst.msk [vmem:[#allocation3 + $0x50] sm:$0xff] %vm1010_vm12, %v1101_v34 }
 0x2a0   : > { %v1082_v39 = vpop.xlane.xlu0 %1081  ;;  %v1084_v46 = vpop.xlane.xlu1 %1083 }
 0x2a1   : > { %v1102_v47 = vadd.f32 %v1082_v39, %v1038_v35  ;;  %v1103_v4 = vadd.f32 %v1084_v46, %v1039_v36  ;;  %v1086_v19 = vpop.xlane.xlu2 %1085 }
 0x2a2   : > { %v1104_v44 = vadd.f32 %v1086_v19, %v1040_v38 }
 0x2a3   : > { %1118 = vst.msk [vmem:[#allocation3 + $0x58] sm:$0xff] %vm1010_vm12, %v1102_v47 }
 0x2a4   : > { %1119 = vst.msk [vmem:[#allocation3 + $0x60] sm:$0xff] %vm1010_vm12, %v1103_v4 }
 0x2a5   : > { %1120 = vst.msk [vmem:[#allocation3 + $0x68] sm:$0xff] %vm1010_vm12, %v1104_v44 }
 0x2a8   : > { %v1088_v18 = vpop.xlane.xlu0 %1087  ;;  %v1090_v42 = vpop.xlane.xlu1 %1089 }
 0x2a9   : > { %v1105_v5 = vadd.f32 %v1088_v18, %v1041_v6  ;;  %v1106_v43 = vadd.f32 %v1090_v42, %v1042_v15 }
 0x2ab   : > { %1121 = vst.msk [vmem:[#allocation3 + $0x70] sm:$0xff] %vm1010_vm12, %v1105_v5 }
 0x2ac   : > { %1122 = vst.msk [vmem:[#allocation3 + $0x78] sm:$0xff] %vm1010_vm12, %v1106_v43 }
 0x2ad PF: > { %p1426_p2 = scmp.ne.s32.totalorder %s1617_s20, 1 }
 0x2af   : > { %1126 = sbr.rel (%p1426_p2) target bundleno = 726 (0x2d6), region = 94 }
 0x2b4   : > { %v1175_v7 = vld [vmem:[#allocation2] sm:$0xff]  ;;  %v1176_v41 = vld [vmem:[#allocation2 + $0x8] sm:$0xff]  ;;  %v1177_v48 = vld [vmem:[#allocation2 + $0x10] sm:$0xff]  ;;  %vm1255_vm5 = vcmask 7168  }
 0x2b5   : > { %v1127_v17 = vld [vmem:[#allocation3] sm:$0xff]  ;;  %1547 = vlog2.f32 %v1175_v7  ;;  %v1128_v28 = vld [vmem:[#allocation3 + $0x8] sm:$0xff]  ;;  %v1129_v40 = vld [vmem:[#allocation3 + $0x10] sm:$0xff] }
 0x2b6   : > { %v1143_v16 = vld [vmem:[%s1749_s12] sm:$0xff]  ;;  %v1144_v29 = vld [vmem:[%s1749_s12 + $0x8] sm:$0xff]  ;;  %1549 = vlog2.f32 %v1176_v41  ;;  %v1145_v12 = vld [vmem:[%s1749_s12 + $0x10] sm:$0xff] }
 0x2b7   : > { %1551 = vlog2.f32 %v1177_v48  ;;  %v1178_v32 = vld [vmem:[#allocation2 + $0x18] sm:$0xff]  ;;  %v1179_v49 = vld [vmem:[#allocation2 + $0x20] sm:$0xff]  ;;  %v1180_v21 = vld [vmem:[#allocation2 + $0x28] sm:$0xff]  ;;  %v1159_v25 = vmul.f32 %v1143_v16, %v1127_v17  ;;  %v1160_v2 = vmul.f32 %v1144_v29, %v1128_v28  ;;  %v1161_v58 = vmul.f32 %v1145_v12, %v1129_v40 }
 0x2b8   : > { %v1130_v33 = vld [vmem:[#allocation3 + $0x18] sm:$0xff]  ;;  %1553 = vlog2.f32 %v1178_v32  ;;  %v1131_v31 = vld [vmem:[#allocation3 + $0x20] sm:$0xff]  ;;  %v1132_v37 = vld [vmem:[#allocation3 + $0x28] sm:$0xff] }
 0x2b9   : > { %v1146_v30 = vld [vmem:[%s1749_s12 + $0x18] sm:$0xff]  ;;  %v1147_v45 = vld [vmem:[%s1749_s12 + $0x20] sm:$0xff]  ;;  %1555 = vlog2.f32 %v1179_v49  ;;  %v1148_v22 = vld [vmem:[%s1749_s12 + $0x28] sm:$0xff] }
 0x2ba   : > { %1557 = vlog2.f32 %v1180_v21  ;;  %v1181_v53 = vld [vmem:[#allocation2 + $0x30] sm:$0xff]  ;;  %v1182_v51 = vld [vmem:[#allocation2 + $0x38] sm:$0xff]  ;;  %v1162_v57 = vmul.f32 %v1146_v30, %v1130_v33  ;;  %v1183_v60 = vld [vmem:[#allocation2 + $0x40] sm:$0xff]  ;;  %v1163_v3 = vmul.f32 %v1147_v45, %v1131_v31  ;;  %v1164_v8 = vmul.f32 %v1148_v22, %v1132_v37 }
 0x2bb   : > { %v1548_v56 = vpop.eup %1547  ;;  %v1133_v52 = vld [vmem:[#allocation3 + $0x30] sm:$0xff]  ;;  %1559 = vlog2.f32 %v1181_v53  ;;  %v1134_v62 = vld [vmem:[#allocation3 + $0x38] sm:$0xff]  ;;  %v1135_v9 = vld [vmem:[#allocation3 + $0x40] sm:$0xff] }
 0x2bc   : > { %v1149_v55 = vld [vmem:[%s1749_s12 + $0x30] sm:$0xff]  ;;  %v1550_v54 = vpop.eup %1549  ;;  %v1192_v59 = vmul.f32 0.6931472, %v1548_v56  ;;  %v1150_v61 = vld [vmem:[%s1749_s12 + $0x38] sm:$0xff]  ;;  %1561 = vlog2.f32 %v1182_v51  ;;  %v1151_v10 = vld [vmem:[%s1749_s12 + $0x40] sm:$0xff] }
 0x2bd   : > { %v1552_v0 = vpop.eup %1551  ;;  %v1194_v1 = vmul.f32 0.6931472, %v1550_v54  ;;  %1563 = vlog2.f32 %v1183_v60  ;;  %v1184_v11 = vld [vmem:[#allocation2 + $0x48] sm:$0xff]  ;;  %v1165_v63 = vmul.f32 %v1149_v55, %v1133_v52  ;;  %v1185_v20 = vld [vmem:[#allocation2 + $0x50] sm:$0xff]  ;;  %v1166_v27 = vmul.f32 %v1150_v61, %v1134_v62  ;;  %v1186_v36 = vld [vmem:[#allocation2 + $0x58] sm:$0xff] }
 0x2be   : > { %v1554_v13 = vpop.eup %1553  ;;  %v1223_v14 = vsub.f32 %v1159_v25, %v1192_v59  ;;  %v1196_v50 = vmul.f32 0.6931472, %v1552_v0  ;;  %1565 = vlog2.f32 %v1184_v11  ;;  %v1136_v34 = vld [vmem:[#allocation3 + $0x48] sm:$0xff]  ;;  %v1167_v4 = vmul.f32 %v1151_v10, %v1135_v9  ;;  %v1187_v19 = vld [vmem:[#allocation2 + $0x60] sm:$0xff]  ;;  %v1137_v42 = vld [vmem:[#allocation3 + $0x50] sm:$0xff] }
 0x2bf   : > { %v1556_v23 = vpop.eup %1555  ;;  %v1224_v24 = vsub.f32 %v1160_v2, %v1194_v1  ;;  %v1198_v26 = vmul.f32 0.6931472, %v1554_v13  ;;  %v1152_v35 = vld [vmem:[%s1749_s12 + $0x48] sm:$0xff]  ;;  %1567 = vlog2.f32 %v1185_v20  ;;  %v1153_v5 = vld [vmem:[%s1749_s12 + $0x50] sm:$0xff]  ;;  %v1138_v28 = vld [vmem:[#allocation3 + $0x58] sm:$0xff] }
 0x2c0   : > { %v1558_v38 = vpop.eup %1557  ;;  %v1239_v39 = vmul.f32 -1.0, %v1223_v14  ;;  %v1225_v46 = vsub.f32 %v1161_v58, %v1196_v50  ;;  %v1200_v47 = vmul.f32 0.6931472, %v1556_v23  ;;  %1569 = vlog2.f32 %v1186_v36  ;;  %v1188_v29 = vld [vmem:[#allocation2 + $0x68] sm:$0xff]  ;;  %v1154_v33 = vld [vmem:[%s1749_s12 + $0x58] sm:$0xff]  ;;  %v1139_v30 = vld [vmem:[#allocation3 + $0x60] sm:$0xff] }
 0x2c1   : > { %v1560_v44 = vpop.eup %1559  ;;  %v1240_v6 = vmul.f32 -1.0, %v1224_v24  ;;  %v1226_v15 = vsub.f32 %v1162_v57, %v1198_v26  ;;  %v1202_v18 = vmul.f32 0.6931472, %v1558_v38  ;;  %v1168_v41 = vmul.f32 %v1152_v35, %v1136_v34  ;;  %v1155_v37 = vld [vmem:[%s1749_s12 + $0x60] sm:$0xff]  ;;  %v1189_v22 = vld [vmem:[#allocation2 + $0x70] sm:$0xff]  ;;  %v1190_v55 = vld [vmem:[#allocation2 + $0x78] sm:$0xff] }
 0x2c2   : > { %v1562_v43 = vpop.eup %1561  ;;  %1256 = vst.msk [vmem:[%s1754_s17] sm:$0xff] %vm1255_vm5, %v1239_v39  ;;  %v1241_v7 = vmul.f32 -1.0, %v1225_v46  ;;  %v1227_v17 = vsub.f32 %v1163_v3, %v1200_v47  ;;  %v1204_v16 = vmul.f32 0.6931472, %v1560_v44  ;;  %1571 = vlog2.f32 %v1187_v19  ;;  %v1140_v0 = vld [vmem:[#allocation3 + $0x68] sm:$0xff]  ;;  %v1141_v13 = vld [vmem:[#allocation3 + $0x70] sm:$0xff] }
 0x2c3   : > { %v1564_v48 = vpop.eup %1563  ;;  %1257 = vst.msk [vmem:[%s1754_s17 + $0x8] sm:$0xff] %vm1255_vm5, %v1240_v6  ;;  %v1242_v40 = vmul.f32 -1.0, %v1226_v15  ;;  %v1228_v12 = vsub.f32 %v1164_v8, %v1202_v18  ;;  %v1206_v32 = vmul.f32 0.6931472, %v1562_v43  ;;  %v1169_v25 = vmul.f32 %v1153_v5, %v1137_v42  ;;  %v1156_v1 = vld [vmem:[%s1749_s12 + $0x68] sm:$0xff]  ;;  %v1157_v14 = vld [vmem:[%s1749_s12 + $0x70] sm:$0xff] }
 0x2c4   : > { %v1566_v49 = vpop.eup %1565  ;;  %1258 = vst.msk [vmem:[%s1754_s17 + $0x10] sm:$0xff] %vm1255_vm5, %v1241_v7  ;;  %v1243_v31 = vmul.f32 -1.0, %v1227_v17  ;;  %v1229_v45 = vsub.f32 %v1165_v63, %v1204_v16  ;;  %v1208_v21 = vmul.f32 0.6931472, %v1564_v48  ;;  %1573 = vlog2.f32 %v1188_v29  ;;  %v1142_v24 = vld [vmem:[#allocation3 + $0x78] sm:$0xff] }
 0x2c5   : > { %v1568_v53 = vpop.eup %1567  ;;  %1259 = vst.msk [vmem:[%s1754_s17 + $0x18] sm:$0xff] %vm1255_vm5, %v1242_v40  ;;  %v1244_v56 = vmul.f32 -1.0, %v1228_v12  ;;  %v1230_v2 = vsub.f32 %v1166_v27, %v1206_v32  ;;  %v1210_v52 = vmul.f32 0.6931472, %v1566_v49  ;;  %v1170_v58 = vmul.f32 %v1154_v33, %v1138_v28  ;;  %v1158_v26 = vld [vmem:[%s1749_s12 + $0x78] sm:$0xff] }
 0x2c6   : > { %1260 = vst.msk [vmem:[%s1754_s17 + $0x20] sm:$0xff] %vm1255_vm5, %v1243_v31  ;;  %v1245_v51 = vmul.f32 -1.0, %v1229_v45  ;;  %v1231_v54 = vsub.f32 %v1167_v4, %v1208_v21  ;;  %v1212_v59 = vmul.f32 0.6931472, %v1568_v53  ;;  %v1570_v57 = vpop.eup %1569  ;;  %v1171_v60 = vmul.f32 %v1155_v37, %v1139_v30 }
 0x2c7   : > { %1261 = vst.msk [vmem:[%s1754_s17 + $0x28] sm:$0xff] %vm1255_vm5, %v1244_v56  ;;  %v1246_v62 = vmul.f32 -1.0, %v1230_v2  ;;  %v1232_v61 = vsub.f32 %v1168_v41, %v1210_v52  ;;  %1575 = vlog2.f32 %v1189_v22  ;;  %v1214_v9 = vmul.f32 0.6931472, %v1570_v57 }
 0x2c8   : > { %1262 = vst.msk [vmem:[%s1754_s17 + $0x30] sm:$0xff] %vm1255_vm5, %v1245_v51  ;;  %v1247_v3 = vmul.f32 -1.0, %v1231_v54  ;;  %v1233_v8 = vsub.f32 %v1169_v25, %v1212_v59  ;;  %1577 = vlog2.f32 %v1190_v55  ;;  %v1572_v10 = vpop.eup %1571  ;;  %v1172_v23 = vmul.f32 %v1156_v1, %v1140_v0 }
 0x2c9   : > { %1263 = vst.msk [vmem:[%s1754_s17 + $0x38] sm:$0xff] %vm1255_vm5, %v1246_v62  ;;  %v1248_v11 = vmul.f32 -1.0, %v1232_v61  ;;  %v1234_v63 = vsub.f32 %v1170_v58, %v1214_v9  ;;  %v1216_v20 = vmul.f32 0.6931472, %v1572_v10  ;;  %v1173_v38 = vmul.f32 %v1157_v14, %v1141_v13 }
 0x2ca   : > { %1264 = vst.msk [vmem:[%s1754_s17 + $0x40] sm:$0xff] %vm1255_vm5, %v1247_v3  ;;  %v1249_v50 = vmul.f32 -1.0, %v1233_v8  ;;  %v1574_v27 = vpop.eup %1573  ;;  %v1174_v46 = vmul.f32 %v1158_v26, %v1142_v24 }
 0x2cb   : > { %1265 = vst.msk [vmem:[%s1754_s17 + $0x48] sm:$0xff] %vm1255_vm5, %v1248_v11  ;;  %v1250_v34 = vmul.f32 -1.0, %v1234_v63  ;;  %v1235_v35 = vsub.f32 %v1171_v60, %v1216_v20  ;;  %v1218_v36 = vmul.f32 0.6931472, %v1574_v27 }
 0x2cc   : > { %1266 = vst.msk [vmem:[%s1754_s17 + $0x50] sm:$0xff] %vm1255_vm5, %v1249_v50 }
 0x2cd   : > { %v1576_v39 = vpop.eup %1575  ;;  %1267 = vst.msk [vmem:[%s1754_s17 + $0x58] sm:$0xff] %vm1255_vm5, %v1250_v34  ;;  %v1251_v4 = vmul.f32 -1.0, %v1235_v35  ;;  %v1236_v19 = vsub.f32 %v1172_v23, %v1218_v36 }
 0x2ce   : > { %v1578_v47 = vpop.eup %1577  ;;  %v1220_v44 = vmul.f32 0.6931472, %v1576_v39 }
 0x2cf   : > { %v1222_v6 = vmul.f32 0.6931472, %v1578_v47  ;;  %1268 = vst.msk [vmem:[%s1754_s17 + $0x60] sm:$0xff] %vm1255_vm5, %v1251_v4  ;;  %v1252_v15 = vmul.f32 -1.0, %v1236_v19 }
 0x2d0   : > { %v1237_v18 = vsub.f32 %v1173_v38, %v1220_v44 }
 0x2d1   : > { %v1238_v42 = vsub.f32 %v1174_v46, %v1222_v6  ;;  %1269 = vst.msk [vmem:[%s1754_s17 + $0x68] sm:$0xff] %vm1255_vm5, %v1252_v15 }
 0x2d2   : > { %v1253_v5 = vmul.f32 -1.0, %v1237_v18 }
 0x2d3   : > { %v1254_v43 = vmul.f32 -1.0, %v1238_v42 }
 0x2d4   : > { %1270 = vst.msk [vmem:[%s1754_s17 + $0x70] sm:$0xff] %vm1255_vm5, %v1253_v5 }
 0x2d5   : > { %1271 = vst.msk [vmem:[%s1754_s17 + $0x78] sm:$0xff] %vm1255_vm5, %v1254_v43 }
 0x2d6 PF: > { %s15_s24 = sadd.s32 1, %s1633_s24   ;;  %s2572_s18 = smov %s1613_s19 }
 0x2d7   : > { %p12_p3 = scmp.ge.s32.totalorder %s15_s24, 6   ;;  %s2573_s19 = smov %s1716_s29 }
 0x2d8   : > { %s2574_s20 = smov %s1625_s22  ;;  %s2575_s21 = smov %s1629_s23 }
 0x2d9   : > { %s2576_s22 = smov %s2579_s25  ;;  %s2577_s23 = smov %s2583_s26 }
 0x2da   :  { %14 = sbr.rel (!%p12_p3) target bundleno = 6 (0x6), region = 141 }

</bundles_post_ra>
